<compile_context>
chip_gen: v7x
topology: tpu7x:2x2x1
jax: 0.10.0
libtpu: 0.0.40
codegen_flags: <defaults>
</compile_context>

<pallas_src>
import functools
import math

import jax
import jax.numpy as jnp
import numpy as np
from jax.experimental import pallas as pl
from jax.experimental.pallas import tpu as pltpu


def _lstm_encoder_kernel(x_ref, a_ref, b_ref, o_ref, *, T, Bp, D, H, O):
    """Everything in registers; 3 lane-dense VMEM inputs, 1 tiny output.

    x_ref : (T*Bp, 2D)  row s*Bp+b = [x[s, b] | x[T-1-s, b]]   (time-paired input)
    a_ref : (RA, 8H)    rows [0:2D)=W_in, [2D:2D+2H)=W_hh (block-diagonal),
                        row 2D+2H = bias. Gate columns interleaved
                        [i_f i_b | f_f f_b | o_f o_b | g_f g_b], each block H wide.
    b_ref : (RB, 128)   rows [0:Bp)  = [sel_ef | sel_eb | sel_of | sel_ob | 0],
                        rows [Bp:Bp+H) = [fc_w_top | fc_w_bot | out_w_top | out_w_bot | 0],
                        row Bp+H     = [fc_b | 0 | out_b | 0].
    o_ref : (Bp, O)
    """
    H2, H4, H6, H8 = 2 * H, 4 * H, 6 * H, 8 * H

    # ---- recurrence weights (lane-dense slab A) ----
    w_in = a_ref[pl.ds(0, 2 * D), :]                       # (2D, 8H)
    w_hh = a_ref[pl.ds(2 * D, H2), :]                      # (2H, 8H) block-diagonal
    bias = a_ref[pl.ds(2 * D + H2, 1), :]                  # (1, 8H)

    # ---- hoisted input projection: one MXU dot for all steps & both directions ----
    xg = jnp.dot(x_ref[...], w_in, preferred_element_type=jnp.float32) + bias  # (T*Bp, 8H)

    # ---- fused fwd/bwd recurrence, fully unrolled, state & outputs in vregs ----
    h2 = jnp.zeros((Bp, H2), jnp.float32)                  # [h_f | h_b]
    c2 = jnp.zeros((Bp, H2), jnp.float32)                  # [c_f | c_b]
    hs = []
    for s in range(T):
        pre = xg[s * Bp:(s + 1) * Bp, :]                   # whole-vreg, sublane-aligned slice
        gates = pre + jnp.dot(h2, w_hh, preferred_element_type=jnp.float32)   # (Bp, 8H)
        sig = jax.nn.sigmoid(gates[:, :H6])                # [i_f i_b | f_f f_b | o_f o_b]
        i2 = sig[:, :H2]
        f2 = sig[:, H2:H4]
        o2 = sig[:, H4:H6]
        g2 = jnp.tanh(gates[:, H6:H8])                     # [g_f | g_b]
        c2 = f2 * c2 + i2 * g2
        h2 = o2 * jnp.tanh(c2)
        hs.append(h2)

    # Merge mode 'sum': enc[t] = fwd_h[t] + bwd_h[t] (bwd output at step s is time T-1-s).
    enc = [hs[t][:, :H] + hs[T - 1 - t][:, H:] for t in range(T)]   # T x (Bp, H)
    hf_fin = hs[T - 1][:, :H]                              # hn[0]
    hb_fin = hs[T - 1][:, H:]                              # hn[-1]

    # ---- dot-product soft attention of hn[-1] over enc, softmax over time ----
    scores = [jnp.sum(hb_fin * enc[t], axis=-1, keepdims=True) for t in range(T)]  # (Bp, 1)
    m = scores[0]
    for t in range(1, T):
        m = jnp.maximum(m, scores[t])
    exps = [jnp.exp(scores[t] - m) for t in range(T)]
    denom = exps[0]
    for t in range(1, T):
        denom = denom + exps[t]
    inv = pl.reciprocal(denom, approx=True)
    ctx = exps[0] * enc[0]
    for t in range(1, T):
        ctx = ctx + exps[t] * enc[t]
    context = ctx * inv                                    # (Bp, H)

    # ---- epilogue weights (lane-packed slab B), no lane concatenates anywhere ----
    sel_blk = b_ref[pl.ds(0, Bp), :]                       # (Bp, 128)
    w_blk = b_ref[pl.ds(Bp, H), :]                         # (H, 128)
    bias_blk = b_ref[pl.ds(Bp + H, 1), :]                  # (1, 128)
    sel_ef = sel_blk[:, 0 * Bp:1 * Bp]
    sel_eb = sel_blk[:, 1 * Bp:2 * Bp]
    sel_of = sel_blk[:, 2 * Bp:3 * Bp]
    sel_ob = sel_blk[:, 3 * Bp:4 * Bp]
    fc_w_top = w_blk[:, 0:H]
    fc_w_bot = w_blk[:, H:H2]
    ow_top = w_blk[:, H2:H2 + O]
    ow_bot = w_blk[:, H2 + O:H2 + 2 * O]
    fc_b = bias_blk[:, 0:H]
    out_b = bias_blk[:, H2:H2 + O]

    # fc(hn.view(-1, 2H)): flat-view row pairing via constant selection matmuls, fc split.
    hn_even = (jnp.dot(sel_ef, hf_fin, preferred_element_type=jnp.float32)
               + jnp.dot(sel_eb, hb_fin, preferred_element_type=jnp.float32))
    hn_odd = (jnp.dot(sel_of, hf_fin, preferred_element_type=jnp.float32)
              + jnp.dot(sel_ob, hb_fin, preferred_element_type=jnp.float32))
    fc_out = (jnp.dot(hn_even, fc_w_top, preferred_element_type=jnp.float32)
              + jnp.dot(hn_odd, fc_w_bot, preferred_element_type=jnp.float32)
              + fc_b)                                      # (Bp, H)

    # out(cat([fc_out, context])) with out_w split instead of a lane concat.
    logits = (jnp.dot(fc_out, ow_top, preferred_element_type=jnp.float32)
              + jnp.dot(context, ow_bot, preferred_element_type=jnp.float32)
              + out_b)                                     # (Bp, O)
    o_ref[...] = jax.nn.sigmoid(logits)


def init_params(key, input_dim, hidden_dim, output_dim):
    D, H, O = input_dim, hidden_dim, output_dim
    ks = jax.random.split(key, 16)
    kl = 1.0 / math.sqrt(H)
    kfc = 1.0 / math.sqrt(2 * H)

    def u(k, shape, bound):
        return jax.random.uniform(k, shape, jnp.float32, -bound, bound)

    return {
        "w_ih_f": u(ks[0], (4 * H, D), kl), "w_hh_f": u(ks[1], (4 * H, H), kl),
        "b_ih_f": u(ks[2], (4 * H,), kl),   "b_hh_f": u(ks[3], (4 * H,), kl),
        "w_ih_b": u(ks[4], (4 * H, D), kl), "w_hh_b": u(ks[5], (4 * H, H), kl),
        "b_ih_b": u(ks[6], (4 * H,), kl),   "b_hh_b": u(ks[7], (4 * H,), kl),
        "fc_w": u(ks[8], (H, 2 * H), kfc),  "fc_b": u(ks[9], (H,), kfc),
        "out_w": u(ks[10], (O, 2 * H), kfc), "out_b": u(ks[11], (O,), kfc),
    }


def lstm_encoder_forward(x, p):
    T, B, D = x.shape
    H = p["w_hh_f"].shape[1]
    O = p["out_w"].shape[0]
    Bp = max(8, -(-B // 8) * 8)            # pad batch to a sublane multiple
    H2, H8 = 2 * H, 8 * H
    assert 4 * Bp <= 128 and H2 + 2 * O <= 128, "epilogue slab packing assumes small H/B/O"

    # ---- slab A: recurrence weights with direction-interleaved gate columns ----
    # PyTorch gate row order is [i, f, g, o]; interleaved column order is [i, f, o, g].
    gate_order = (0, 1, 3, 2)
    wih_f = np.asarray(p["w_ih_f"]); wih_b = np.asarray(p["w_ih_b"])
    whh_f = np.asarray(p["w_hh_f"]); whh_b = np.asarray(p["w_hh_b"])
    b_f = np.asarray(p["b_ih_f"]) + np.asarray(p["b_hh_f"])
    b_b = np.asarray(p["b_ih_b"]) + np.asarray(p["b_hh_b"])

    w_in = np.zeros((2 * D, H8), np.float32)      # rows [0:D) act on x[s], [D:2D) on x[T-1-s]
    w_hh = np.zeros((H2, H8), np.float32)         # block-diagonal: h_f -> fwd cols, h_b -> bwd cols
    bias = np.zeros((H8,), np.float32)
    for k, g in enumerate(gate_order):
        cf = slice(2 * k * H, (2 * k + 1) * H)            # forward columns for this gate
        cb = slice((2 * k + 1) * H, (2 * k + 2) * H)      # backward columns for this gate
        rows = slice(g * H, (g + 1) * H)
        w_in[:D, cf] = wih_f[rows].T
        w_in[D:, cb] = wih_b[rows].T
        w_hh[:H, cf] = whh_f[rows].T
        w_hh[H:, cb] = whh_b[rows].T
        bias[cf] = b_f[rows]
        bias[cb] = b_b[rows]

    ra = 2 * D + H2 + 1
    ra_pad = -(-ra // 8) * 8
    slab_a = np.zeros((ra_pad, H8), np.float32)
    slab_a[:2 * D] = w_in
    slab_a[2 * D:2 * D + H2] = w_hh
    slab_a[2 * D + H2] = bias

    # ---- slab B: selection matrices (torch hn.view(-1, 2H) pairing) + split fc/out ----
    sel = np.zeros((4, Bp, Bp), np.float32)       # ef, eb, of, ob
    for r in range(B):
        for idx, j in ((0, 2 * r), (2, 2 * r + 1)):       # even chunk -> ef/eb, odd -> of/ob
            if j < B:
                sel[idx, r, j] = 1.0              # forward hidden of sample j
            else:
                sel[idx + 1, r, j - B] = 1.0      # backward hidden of sample j - B
    fc_wT = np.asarray(p["fc_w"]).T               # (2H, H)
    out_wT = np.asarray(p["out_w"]).T             # (2H, O)
    rb = Bp + H + 1
    rb_pad = -(-rb // 8) * 8
    slab_b = np.zeros((rb_pad, 128), np.float32)
    for i in range(4):
        slab_b[:Bp, i * Bp:(i + 1) * Bp] = sel[i]
    slab_b[Bp:Bp + H, 0:H] = fc_wT[:H]
    slab_b[Bp:Bp + H, H:H2] = fc_wT[H:]
    slab_b[Bp:Bp + H, H2:H2 + O] = out_wT[:H]
    slab_b[Bp:Bp + H, H2 + O:H2 + 2 * O] = out_wT[H:]
    slab_b[Bp + H, 0:H] = np.asarray(p["fc_b"])
    slab_b[Bp + H, H2:H2 + O] = np.asarray(p["out_b"])

    # ---- time-paired, batch-padded input: row (s, b) = [x[s, b] | x[T-1-s, b]] ----
    x_pad = jnp.zeros((T, Bp, D), jnp.float32).at[:, :B, :].set(x)
    x_pair = jnp.concatenate([x_pad, x_pad[::-1]], axis=-1).reshape(T * Bp, 2 * D)

    kernel = functools.partial(_lstm_encoder_kernel, T=T, Bp=Bp, D=D, H=H, O=O)
    vmem = pl.BlockSpec(memory_space=pltpu.MemorySpace.VMEM)
    out = pl.pallas_call(
        kernel,
        out_shape=jax.ShapeDtypeStruct((Bp, O), jnp.float32),
        in_specs=[vmem, vmem, vmem],
        out_specs=vmem,
    )(x_pair, jnp.asarray(slab_a), jnp.asarray(slab_b))
    return out[:B]


def reference_forward(x, p):
    """Pure-JAX reference matching PyTorch semantics (for a correctness check)."""
    T, B, _ = x.shape
    H = p["w_hh_f"].shape[1]

    def cell(x_t, h, c, wih, whh, b):
        g = x_t @ wih.T + h @ whh.T + b
        i = jax.nn.sigmoid(g[:, :H]); f = jax.nn.sigmoid(g[:, H:2 * H])
        gg = jnp.tanh(g[:, 2 * H:3 * H]); o = jax.nn.sigmoid(g[:, 3 * H:])
        c = f * c + i * gg
        return o * jnp.tanh(c), c

    h = jnp.zeros((B, H)); c = jnp.zeros((B, H))
    b_f = p["b_ih_f"] + p["b_hh_f"]
    fwd = []
    for t in range(T):
        h, c = cell(x[t], h, c, p["w_ih_f"], p["w_hh_f"], b_f)
        fwd.append(h)
    h_f_final = h

    h = jnp.zeros((B, H)); c = jnp.zeros((B, H))
    b_b = p["b_ih_b"] + p["b_hh_b"]
    bwd = [None] * T
    for t in range(T - 1, -1, -1):
        h, c = cell(x[t], h, c, p["w_ih_b"], p["w_hh_b"], b_b)
        bwd[t] = h
    h_b_final = h

    enc = jnp.stack([fwd[t] + bwd[t] for t in range(T)], axis=0)       # (T,B,H)
    scores = jnp.einsum("bh,tbh->bt", h_b_final, enc)                  # (B,T)
    attn = jax.nn.softmax(scores, axis=1)
    context = jnp.einsum("bt,tbh->bh", attn, enc)                      # (B,H)
    hn_flat = jnp.stack([h_f_final, h_b_final], 0).reshape(-1, 2 * H)  # PyTorch .view(-1, 2H)
    fc_out = hn_flat @ p["fc_w"].T + p["fc_b"]
    feat = jnp.concatenate([fc_out, context], axis=1)
    return jax.nn.sigmoid(feat @ p["out_w"].T + p["out_b"])


if __name__ == "__main__":
    T, B, D, H, O = 8, 2, 16, 32, 8   # seq=8, batch=2, input_dim=16, hidden=32, output=8

    key = jax.random.PRNGKey(0)
    kx, kp = jax.random.split(key)
    x = jax.random.normal(kx, (T, B, D), dtype=jnp.float32)
    params = init_params(kp, D, H, O)

    out = jax.block_until_ready(lstm_encoder_forward(x, params))
    ref = jax.block_until_ready(reference_forward(x, params))

    assert out.shape == (B, O)
    assert np.all(np.isfinite(np.asarray(out)))
    assert np.max(np.abs(np.asarray(out) - np.asarray(ref))) < 2e-2, "mismatch vs reference"

    print("KERNEL_OK")
</pallas_src>

<mosaic_0001>
module attributes {stable_mosaic.version = 11 : i64} {
  func.func @_lstm_encoder_kernel(%arg0: memref<64x32xf32, #tpu.memory_space<vmem>>, %arg1: memref<104x256xf32, #tpu.memory_space<vmem>>, %arg2: memref<48x128xf32, #tpu.memory_space<vmem>>, %arg3: memref<8x8xf32, #tpu.memory_space<vmem>>) attributes {dimension_semantics = [], scalar_prefetch = 0 : i64, scratch_operands = 0 : i64, tpu.core_type = #tpu.core_type<tc>} {
    %c0 = arith.constant 0 : index
    %c0_0 = arith.constant 0 : index
    %0 = vector.load %arg1[%c0, %c0_0] : memref<104x256xf32, #tpu.memory_space<vmem>>, vector<32x256xf32>
    %c32 = arith.constant 32 : index
    %c0_1 = arith.constant 0 : index
    %1 = vector.load %arg1[%c32, %c0_1] : memref<104x256xf32, #tpu.memory_space<vmem>>, vector<64x256xf32>
    %c96 = arith.constant 96 : index
    %c0_2 = arith.constant 0 : index
    %2 = vector.load %arg1[%c96, %c0_2] : memref<104x256xf32, #tpu.memory_space<vmem>>, vector<1x256xf32>
    %c0_3 = arith.constant 0 : index
    %c0_4 = arith.constant 0 : index
    %3 = vector.load %arg0[%c0_3, %c0_4] : memref<64x32xf32, #tpu.memory_space<vmem>>, vector<64x32xf32>
    %cst = arith.constant dense<0.000000e+00> : vector<64x256xf32>
    %4 = tpu.matmul %3, %0, %cst {dimension_numbers = #tpu.dot_dimension_numbers<[1], [0], [0], [1], [0, 0, 1, 1], [], []>} : vector<64x32xf32>, vector<32x256xf32>, vector<64x256xf32> -> vector<64x256xf32>
    %5 = vector.broadcast %2 : vector<1x256xf32> to vector<64x256xf32>
    %6 = arith.addf %4, %5 : vector<64x256xf32>
    %cst_5 = arith.constant 0.000000e+00 : f32
    %7 = vector.broadcast %cst_5 : f32 to vector<8x64xf32>
    %cst_6 = arith.constant 0.000000e+00 : f32
    %8 = vector.broadcast %cst_6 : f32 to vector<8x64xf32>
    %9 = vector.extract_strided_slice %6 {offsets = [0, 0], sizes = [8, 256], strides = [1, 1]} : vector<64x256xf32> to vector<8x256xf32>
    %cst_7 = arith.constant dense<0.000000e+00> : vector<8x256xf32>
    %10 = tpu.matmul %7, %1, %cst_7 {dimension_numbers = #tpu.dot_dimension_numbers<[1], [0], [0], [1], [0, 0, 1, 1], [], []>} : vector<8x64xf32>, vector<64x256xf32>, vector<8x256xf32> -> vector<8x256xf32>
    %11 = arith.addf %9, %10 : vector<8x256xf32>
    %12 = vector.extract_strided_slice %11 {offsets = [0, 0], sizes = [8, 192], strides = [1, 1]} : vector<8x256xf32> to vector<8x192xf32>
    %13 = arith.negf %12 : vector<8x192xf32>
    %14 = math.exp %13 : vector<8x192xf32>
    %cst_8 = arith.constant 1.000000e+00 : f32
    %15 = vector.broadcast %cst_8 : f32 to vector<8x192xf32>
    %16 = arith.addf %15, %14 : vector<8x192xf32>
    %17 = arith.divf %15, %16 : vector<8x192xf32>
    %18 = vector.extract_strided_slice %17 {offsets = [0, 0], sizes = [8, 64], strides = [1, 1]} : vector<8x192xf32> to vector<8x64xf32>
    %19 = vector.extract_strided_slice %17 {offsets = [0, 64], sizes = [8, 64], strides = [1, 1]} : vector<8x192xf32> to vector<8x64xf32>
    %20 = vector.extract_strided_slice %17 {offsets = [0, 128], sizes = [8, 64], strides = [1, 1]} : vector<8x192xf32> to vector<8x64xf32>
    %21 = vector.extract_strided_slice %11 {offsets = [0, 192], sizes = [8, 64], strides = [1, 1]} : vector<8x256xf32> to vector<8x64xf32>
    %22 = math.tanh %21 : vector<8x64xf32>
    %23 = arith.mulf %19, %8 : vector<8x64xf32>
    %24 = arith.mulf %18, %22 : vector<8x64xf32>
    %25 = arith.addf %23, %24 : vector<8x64xf32>
    %26 = math.tanh %25 : vector<8x64xf32>
    %27 = arith.mulf %20, %26 : vector<8x64xf32>
    %28 = vector.extract_strided_slice %6 {offsets = [8, 0], sizes = [8, 256], strides = [1, 1]} : vector<64x256xf32> to vector<8x256xf32>
    %cst_9 = arith.constant dense<0.000000e+00> : vector<8x256xf32>
    %29 = tpu.matmul %27, %1, %cst_9 {dimension_numbers = #tpu.dot_dimension_numbers<[1], [0], [0], [1], [0, 0, 1, 1], [], []>} : vector<8x64xf32>, vector<64x256xf32>, vector<8x256xf32> -> vector<8x256xf32>
    %30 = arith.addf %28, %29 : vector<8x256xf32>
    %31 = vector.extract_strided_slice %30 {offsets = [0, 0], sizes = [8, 192], strides = [1, 1]} : vector<8x256xf32> to vector<8x192xf32>
    %32 = arith.negf %31 : vector<8x192xf32>
    %33 = math.exp %32 : vector<8x192xf32>
    %cst_10 = arith.constant 1.000000e+00 : f32
    %34 = vector.broadcast %cst_10 : f32 to vector<8x192xf32>
    %35 = arith.addf %34, %33 : vector<8x192xf32>
    %36 = arith.divf %34, %35 : vector<8x192xf32>
    %37 = vector.extract_strided_slice %36 {offsets = [0, 0], sizes = [8, 64], strides = [1, 1]} : vector<8x192xf32> to vector<8x64xf32>
    %38 = vector.extract_strided_slice %36 {offsets = [0, 64], sizes = [8, 64], strides = [1, 1]} : vector<8x192xf32> to vector<8x64xf32>
    %39 = vector.extract_strided_slice %36 {offsets = [0, 128], sizes = [8, 64], strides = [1, 1]} : vector<8x192xf32> to vector<8x64xf32>
    %40 = vector.extract_strided_slice %30 {offsets = [0, 192], sizes = [8, 64], strides = [1, 1]} : vector<8x256xf32> to vector<8x64xf32>
    %41 = math.tanh %40 : vector<8x64xf32>
    %42 = arith.mulf %38, %25 : vector<8x64xf32>
    %43 = arith.mulf %37, %41 : vector<8x64xf32>
    %44 = arith.addf %42, %43 : vector<8x64xf32>
    %45 = math.tanh %44 : vector<8x64xf32>
    %46 = arith.mulf %39, %45 : vector<8x64xf32>
    %47 = vector.extract_strided_slice %6 {offsets = [16, 0], sizes = [8, 256], strides = [1, 1]} : vector<64x256xf32> to vector<8x256xf32>
    %cst_11 = arith.constant dense<0.000000e+00> : vector<8x256xf32>
    %48 = tpu.matmul %46, %1, %cst_11 {dimension_numbers = #tpu.dot_dimension_numbers<[1], [0], [0], [1], [0, 0, 1, 1], [], []>} : vector<8x64xf32>, vector<64x256xf32>, vector<8x256xf32> -> vector<8x256xf32>
    %49 = arith.addf %47, %48 : vector<8x256xf32>
    %50 = vector.extract_strided_slice %49 {offsets = [0, 0], sizes = [8, 192], strides = [1, 1]} : vector<8x256xf32> to vector<8x192xf32>
    %51 = arith.negf %50 : vector<8x192xf32>
    %52 = math.exp %51 : vector<8x192xf32>
    %cst_12 = arith.constant 1.000000e+00 : f32
    %53 = vector.broadcast %cst_12 : f32 to vector<8x192xf32>
    %54 = arith.addf %53, %52 : vector<8x192xf32>
    %55 = arith.divf %53, %54 : vector<8x192xf32>
    %56 = vector.extract_strided_slice %55 {offsets = [0, 0], sizes = [8, 64], strides = [1, 1]} : vector<8x192xf32> to vector<8x64xf32>
    %57 = vector.extract_strided_slice %55 {offsets = [0, 64], sizes = [8, 64], strides = [1, 1]} : vector<8x192xf32> to vector<8x64xf32>
    %58 = vector.extract_strided_slice %55 {offsets = [0, 128], sizes = [8, 64], strides = [1, 1]} : vector<8x192xf32> to vector<8x64xf32>
    %59 = vector.extract_strided_slice %49 {offsets = [0, 192], sizes = [8, 64], strides = [1, 1]} : vector<8x256xf32> to vector<8x64xf32>
    %60 = math.tanh %59 : vector<8x64xf32>
    %61 = arith.mulf %57, %44 : vector<8x64xf32>
    %62 = arith.mulf %56, %60 : vector<8x64xf32>
    %63 = arith.addf %61, %62 : vector<8x64xf32>
    %64 = math.tanh %63 : vector<8x64xf32>
    %65 = arith.mulf %58, %64 : vector<8x64xf32>
    %66 = vector.extract_strided_slice %6 {offsets = [24, 0], sizes = [8, 256], strides = [1, 1]} : vector<64x256xf32> to vector<8x256xf32>
    %cst_13 = arith.constant dense<0.000000e+00> : vector<8x256xf32>
    %67 = tpu.matmul %65, %1, %cst_13 {dimension_numbers = #tpu.dot_dimension_numbers<[1], [0], [0], [1], [0, 0, 1, 1], [], []>} : vector<8x64xf32>, vector<64x256xf32>, vector<8x256xf32> -> vector<8x256xf32>
    %68 = arith.addf %66, %67 : vector<8x256xf32>
    %69 = vector.extract_strided_slice %68 {offsets = [0, 0], sizes = [8, 192], strides = [1, 1]} : vector<8x256xf32> to vector<8x192xf32>
    %70 = arith.negf %69 : vector<8x192xf32>
    %71 = math.exp %70 : vector<8x192xf32>
    %cst_14 = arith.constant 1.000000e+00 : f32
    %72 = vector.broadcast %cst_14 : f32 to vector<8x192xf32>
    %73 = arith.addf %72, %71 : vector<8x192xf32>
    %74 = arith.divf %72, %73 : vector<8x192xf32>
    %75 = vector.extract_strided_slice %74 {offsets = [0, 0], sizes = [8, 64], strides = [1, 1]} : vector<8x192xf32> to vector<8x64xf32>
    %76 = vector.extract_strided_slice %74 {offsets = [0, 64], sizes = [8, 64], strides = [1, 1]} : vector<8x192xf32> to vector<8x64xf32>
    %77 = vector.extract_strided_slice %74 {offsets = [0, 128], sizes = [8, 64], strides = [1, 1]} : vector<8x192xf32> to vector<8x64xf32>
    %78 = vector.extract_strided_slice %68 {offsets = [0, 192], sizes = [8, 64], strides = [1, 1]} : vector<8x256xf32> to vector<8x64xf32>
    %79 = math.tanh %78 : vector<8x64xf32>
    %80 = arith.mulf %76, %63 : vector<8x64xf32>
    %81 = arith.mulf %75, %79 : vector<8x64xf32>
    %82 = arith.addf %80, %81 : vector<8x64xf32>
    %83 = math.tanh %82 : vector<8x64xf32>
    %84 = arith.mulf %77, %83 : vector<8x64xf32>
    %85 = vector.extract_strided_slice %6 {offsets = [32, 0], sizes = [8, 256], strides = [1, 1]} : vector<64x256xf32> to vector<8x256xf32>
    %cst_15 = arith.constant dense<0.000000e+00> : vector<8x256xf32>
    %86 = tpu.matmul %84, %1, %cst_15 {dimension_numbers = #tpu.dot_dimension_numbers<[1], [0], [0], [1], [0, 0, 1, 1], [], []>} : vector<8x64xf32>, vector<64x256xf32>, vector<8x256xf32> -> vector<8x256xf32>
    %87 = arith.addf %85, %86 : vector<8x256xf32>
    %88 = vector.extract_strided_slice %87 {offsets = [0, 0], sizes = [8, 192], strides = [1, 1]} : vector<8x256xf32> to vector<8x192xf32>
    %89 = arith.negf %88 : vector<8x192xf32>
    %90 = math.exp %89 : vector<8x192xf32>
    %cst_16 = arith.constant 1.000000e+00 : f32
    %91 = vector.broadcast %cst_16 : f32 to vector<8x192xf32>
    %92 = arith.addf %91, %90 : vector<8x192xf32>
    %93 = arith.divf %91, %92 : vector<8x192xf32>
    %94 = vector.extract_strided_slice %93 {offsets = [0, 0], sizes = [8, 64], strides = [1, 1]} : vector<8x192xf32> to vector<8x64xf32>
    %95 = vector.extract_strided_slice %93 {offsets = [0, 64], sizes = [8, 64], strides = [1, 1]} : vector<8x192xf32> to vector<8x64xf32>
    %96 = vector.extract_strided_slice %93 {offsets = [0, 128], sizes = [8, 64], strides = [1, 1]} : vector<8x192xf32> to vector<8x64xf32>
    %97 = vector.extract_strided_slice %87 {offsets = [0, 192], sizes = [8, 64], strides = [1, 1]} : vector<8x256xf32> to vector<8x64xf32>
    %98 = math.tanh %97 : vector<8x64xf32>
    %99 = arith.mulf %95, %82 : vector<8x64xf32>
    %100 = arith.mulf %94, %98 : vector<8x64xf32>
    %101 = arith.addf %99, %100 : vector<8x64xf32>
    %102 = math.tanh %101 : vector<8x64xf32>
    %103 = arith.mulf %96, %102 : vector<8x64xf32>
    %104 = vector.extract_strided_slice %6 {offsets = [40, 0], sizes = [8, 256], strides = [1, 1]} : vector<64x256xf32> to vector<8x256xf32>
    %cst_17 = arith.constant dense<0.000000e+00> : vector<8x256xf32>
    %105 = tpu.matmul %103, %1, %cst_17 {dimension_numbers = #tpu.dot_dimension_numbers<[1], [0], [0], [1], [0, 0, 1, 1], [], []>} : vector<8x64xf32>, vector<64x256xf32>, vector<8x256xf32> -> vector<8x256xf32>
    %106 = arith.addf %104, %105 : vector<8x256xf32>
    %107 = vector.extract_strided_slice %106 {offsets = [0, 0], sizes = [8, 192], strides = [1, 1]} : vector<8x256xf32> to vector<8x192xf32>
    %108 = arith.negf %107 : vector<8x192xf32>
    %109 = math.exp %108 : vector<8x192xf32>
    %cst_18 = arith.constant 1.000000e+00 : f32
    %110 = vector.broadcast %cst_18 : f32 to vector<8x192xf32>
    %111 = arith.addf %110, %109 : vector<8x192xf32>
    %112 = arith.divf %110, %111 : vector<8x192xf32>
    %113 = vector.extract_strided_slice %112 {offsets = [0, 0], sizes = [8, 64], strides = [1, 1]} : vector<8x192xf32> to vector<8x64xf32>
    %114 = vector.extract_strided_slice %112 {offsets = [0, 64], sizes = [8, 64], strides = [1, 1]} : vector<8x192xf32> to vector<8x64xf32>
    %115 = vector.extract_strided_slice %112 {offsets = [0, 128], sizes = [8, 64], strides = [1, 1]} : vector<8x192xf32> to vector<8x64xf32>
    %116 = vector.extract_strided_slice %106 {offsets = [0, 192], sizes = [8, 64], strides = [1, 1]} : vector<8x256xf32> to vector<8x64xf32>
    %117 = math.tanh %116 : vector<8x64xf32>
    %118 = arith.mulf %114, %101 : vector<8x64xf32>
    %119 = arith.mulf %113, %117 : vector<8x64xf32>
    %120 = arith.addf %118, %119 : vector<8x64xf32>
    %121 = math.tanh %120 : vector<8x64xf32>
    %122 = arith.mulf %115, %121 : vector<8x64xf32>
    %123 = vector.extract_strided_slice %6 {offsets = [48, 0], sizes = [8, 256], strides = [1, 1]} : vector<64x256xf32> to vector<8x256xf32>
    %cst_19 = arith.constant dense<0.000000e+00> : vector<8x256xf32>
    %124 = tpu.matmul %122, %1, %cst_19 {dimension_numbers = #tpu.dot_dimension_numbers<[1], [0], [0], [1], [0, 0, 1, 1], [], []>} : vector<8x64xf32>, vector<64x256xf32>, vector<8x256xf32> -> vector<8x256xf32>
    %125 = arith.addf %123, %124 : vector<8x256xf32>
    %126 = vector.extract_strided_slice %125 {offsets = [0, 0], sizes = [8, 192], strides = [1, 1]} : vector<8x256xf32> to vector<8x192xf32>
    %127 = arith.negf %126 : vector<8x192xf32>
    %128 = math.exp %127 : vector<8x192xf32>
    %cst_20 = arith.constant 1.000000e+00 : f32
    %129 = vector.broadcast %cst_20 : f32 to vector<8x192xf32>
    %130 = arith.addf %129, %128 : vector<8x192xf32>
    %131 = arith.divf %129, %130 : vector<8x192xf32>
    %132 = vector.extract_strided_slice %131 {offsets = [0, 0], sizes = [8, 64], strides = [1, 1]} : vector<8x192xf32> to vector<8x64xf32>
    %133 = vector.extract_strided_slice %131 {offsets = [0, 64], sizes = [8, 64], strides = [1, 1]} : vector<8x192xf32> to vector<8x64xf32>
    %134 = vector.extract_strided_slice %131 {offsets = [0, 128], sizes = [8, 64], strides = [1, 1]} : vector<8x192xf32> to vector<8x64xf32>
    %135 = vector.extract_strided_slice %125 {offsets = [0, 192], sizes = [8, 64], strides = [1, 1]} : vector<8x256xf32> to vector<8x64xf32>
    %136 = math.tanh %135 : vector<8x64xf32>
    %137 = arith.mulf %133, %120 : vector<8x64xf32>
    %138 = arith.mulf %132, %136 : vector<8x64xf32>
    %139 = arith.addf %137, %138 : vector<8x64xf32>
    %140 = math.tanh %139 : vector<8x64xf32>
    %141 = arith.mulf %134, %140 : vector<8x64xf32>
    %142 = vector.extract_strided_slice %6 {offsets = [56, 0], sizes = [8, 256], strides = [1, 1]} : vector<64x256xf32> to vector<8x256xf32>
    %cst_21 = arith.constant dense<0.000000e+00> : vector<8x256xf32>
    %143 = tpu.matmul %141, %1, %cst_21 {dimension_numbers = #tpu.dot_dimension_numbers<[1], [0], [0], [1], [0, 0, 1, 1], [], []>} : vector<8x64xf32>, vector<64x256xf32>, vector<8x256xf32> -> vector<8x256xf32>
    %144 = arith.addf %142, %143 : vector<8x256xf32>
    %145 = vector.extract_strided_slice %144 {offsets = [0, 0], sizes = [8, 192], strides = [1, 1]} : vector<8x256xf32> to vector<8x192xf32>
    %146 = arith.negf %145 : vector<8x192xf32>
    %147 = math.exp %146 : vector<8x192xf32>
    %cst_22 = arith.constant 1.000000e+00 : f32
    %148 = vector.broadcast %cst_22 : f32 to vector<8x192xf32>
    %149 = arith.addf %148, %147 : vector<8x192xf32>
    %150 = arith.divf %148, %149 : vector<8x192xf32>
    %151 = vector.extract_strided_slice %150 {offsets = [0, 0], sizes = [8, 64], strides = [1, 1]} : vector<8x192xf32> to vector<8x64xf32>
    %152 = vector.extract_strided_slice %150 {offsets = [0, 64], sizes = [8, 64], strides = [1, 1]} : vector<8x192xf32> to vector<8x64xf32>
    %153 = vector.extract_strided_slice %150 {offsets = [0, 128], sizes = [8, 64], strides = [1, 1]} : vector<8x192xf32> to vector<8x64xf32>
    %154 = vector.extract_strided_slice %144 {offsets = [0, 192], sizes = [8, 64], strides = [1, 1]} : vector<8x256xf32> to vector<8x64xf32>
    %155 = math.tanh %154 : vector<8x64xf32>
    %156 = arith.mulf %152, %139 : vector<8x64xf32>
    %157 = arith.mulf %151, %155 : vector<8x64xf32>
    %158 = arith.addf %156, %157 : vector<8x64xf32>
    %159 = math.tanh %158 : vector<8x64xf32>
    %160 = arith.mulf %153, %159 : vector<8x64xf32>
    %161 = vector.extract_strided_slice %27 {offsets = [0, 0], sizes = [8, 32], strides = [1, 1]} : vector<8x64xf32> to vector<8x32xf32>
    %162 = vector.extract_strided_slice %160 {offsets = [0, 32], sizes = [8, 32], strides = [1, 1]} : vector<8x64xf32> to vector<8x32xf32>
    %163 = arith.addf %161, %162 : vector<8x32xf32>
    %164 = vector.extract_strided_slice %46 {offsets = [0, 0], sizes = [8, 32], strides = [1, 1]} : vector<8x64xf32> to vector<8x32xf32>
    %165 = vector.extract_strided_slice %141 {offsets = [0, 32], sizes = [8, 32], strides = [1, 1]} : vector<8x64xf32> to vector<8x32xf32>
    %166 = arith.addf %164, %165 : vector<8x32xf32>
    %167 = vector.extract_strided_slice %65 {offsets = [0, 0], sizes = [8, 32], strides = [1, 1]} : vector<8x64xf32> to vector<8x32xf32>
    %168 = vector.extract_strided_slice %122 {offsets = [0, 32], sizes = [8, 32], strides = [1, 1]} : vector<8x64xf32> to vector<8x32xf32>
    %169 = arith.addf %167, %168 : vector<8x32xf32>
    %170 = vector.extract_strided_slice %84 {offsets = [0, 0], sizes = [8, 32], strides = [1, 1]} : vector<8x64xf32> to vector<8x32xf32>
    %171 = vector.extract_strided_slice %103 {offsets = [0, 32], sizes = [8, 32], strides = [1, 1]} : vector<8x64xf32> to vector<8x32xf32>
    %172 = arith.addf %170, %171 : vector<8x32xf32>
    %173 = vector.extract_strided_slice %103 {offsets = [0, 0], sizes = [8, 32], strides = [1, 1]} : vector<8x64xf32> to vector<8x32xf32>
    %174 = vector.extract_strided_slice %84 {offsets = [0, 32], sizes = [8, 32], strides = [1, 1]} : vector<8x64xf32> to vector<8x32xf32>
    %175 = arith.addf %173, %174 : vector<8x32xf32>
    %176 = vector.extract_strided_slice %122 {offsets = [0, 0], sizes = [8, 32], strides = [1, 1]} : vector<8x64xf32> to vector<8x32xf32>
    %177 = vector.extract_strided_slice %65 {offsets = [0, 32], sizes = [8, 32], strides = [1, 1]} : vector<8x64xf32> to vector<8x32xf32>
    %178 = arith.addf %176, %177 : vector<8x32xf32>
    %179 = vector.extract_strided_slice %141 {offsets = [0, 0], sizes = [8, 32], strides = [1, 1]} : vector<8x64xf32> to vector<8x32xf32>
    %180 = vector.extract_strided_slice %46 {offsets = [0, 32], sizes = [8, 32], strides = [1, 1]} : vector<8x64xf32> to vector<8x32xf32>
    %181 = arith.addf %179, %180 : vector<8x32xf32>
    %182 = vector.extract_strided_slice %160 {offsets = [0, 0], sizes = [8, 32], strides = [1, 1]} : vector<8x64xf32> to vector<8x32xf32>
    %183 = vector.extract_strided_slice %27 {offsets = [0, 32], sizes = [8, 32], strides = [1, 1]} : vector<8x64xf32> to vector<8x32xf32>
    %184 = arith.addf %182, %183 : vector<8x32xf32>
    %185 = vector.extract_strided_slice %160 {offsets = [0, 0], sizes = [8, 32], strides = [1, 1]} : vector<8x64xf32> to vector<8x32xf32>
    %186 = vector.extract_strided_slice %160 {offsets = [0, 32], sizes = [8, 32], strides = [1, 1]} : vector<8x64xf32> to vector<8x32xf32>
    %187 = arith.mulf %186, %163 : vector<8x32xf32>
    %cst_23 = arith.constant dense<0.000000e+00> : vector<8xf32>
    %188 = vector.multi_reduction <add>, %187, %cst_23 [1] : vector<8x32xf32> to vector<8xf32>
    %189 = vector.shape_cast %188 : vector<8xf32> to vector<8x1xf32>
    %190 = arith.mulf %186, %166 : vector<8x32xf32>
    %cst_24 = arith.constant dense<0.000000e+00> : vector<8xf32>
    %191 = vector.multi_reduction <add>, %190, %cst_24 [1] : vector<8x32xf32> to vector<8xf32>
    %192 = vector.shape_cast %191 : vector<8xf32> to vector<8x1xf32>
    %193 = arith.mulf %186, %169 : vector<8x32xf32>
    %cst_25 = arith.constant dense<0.000000e+00> : vector<8xf32>
    %194 = vector.multi_reduction <add>, %193, %cst_25 [1] : vector<8x32xf32> to vector<8xf32>
    %195 = vector.shape_cast %194 : vector<8xf32> to vector<8x1xf32>
    %196 = arith.mulf %186, %172 : vector<8x32xf32>
    %cst_26 = arith.constant dense<0.000000e+00> : vector<8xf32>
    %197 = vector.multi_reduction <add>, %196, %cst_26 [1] : vector<8x32xf32> to vector<8xf32>
    %198 = vector.shape_cast %197 : vector<8xf32> to vector<8x1xf32>
    %199 = arith.mulf %186, %175 : vector<8x32xf32>
    %cst_27 = arith.constant dense<0.000000e+00> : vector<8xf32>
    %200 = vector.multi_reduction <add>, %199, %cst_27 [1] : vector<8x32xf32> to vector<8xf32>
    %201 = vector.shape_cast %200 : vector<8xf32> to vector<8x1xf32>
    %202 = arith.mulf %186, %178 : vector<8x32xf32>
    %cst_28 = arith.constant dense<0.000000e+00> : vector<8xf32>
    %203 = vector.multi_reduction <add>, %202, %cst_28 [1] : vector<8x32xf32> to vector<8xf32>
    %204 = vector.shape_cast %203 : vector<8xf32> to vector<8x1xf32>
    %205 = arith.mulf %186, %181 : vector<8x32xf32>
    %cst_29 = arith.constant dense<0.000000e+00> : vector<8xf32>
    %206 = vector.multi_reduction <add>, %205, %cst_29 [1] : vector<8x32xf32> to vector<8xf32>
    %207 = vector.shape_cast %206 : vector<8xf32> to vector<8x1xf32>
    %208 = arith.mulf %186, %184 : vector<8x32xf32>
    %cst_30 = arith.constant dense<0.000000e+00> : vector<8xf32>
    %209 = vector.multi_reduction <add>, %208, %cst_30 [1] : vector<8x32xf32> to vector<8xf32>
    %210 = vector.shape_cast %209 : vector<8xf32> to vector<8x1xf32>
    %211 = arith.maximumf %189, %192 : vector<8x1xf32>
    %212 = arith.maximumf %211, %195 : vector<8x1xf32>
    %213 = arith.maximumf %212, %198 : vector<8x1xf32>
    %214 = arith.maximumf %213, %201 : vector<8x1xf32>
    %215 = arith.maximumf %214, %204 : vector<8x1xf32>
    %216 = arith.maximumf %215, %207 : vector<8x1xf32>
    %217 = arith.maximumf %216, %210 : vector<8x1xf32>
    %218 = arith.subf %189, %217 : vector<8x1xf32>
    %219 = math.exp %218 : vector<8x1xf32>
    %220 = arith.subf %192, %217 : vector<8x1xf32>
    %221 = math.exp %220 : vector<8x1xf32>
    %222 = arith.subf %195, %217 : vector<8x1xf32>
    %223 = math.exp %222 : vector<8x1xf32>
    %224 = arith.subf %198, %217 : vector<8x1xf32>
    %225 = math.exp %224 : vector<8x1xf32>
    %226 = arith.subf %201, %217 : vector<8x1xf32>
    %227 = math.exp %226 : vector<8x1xf32>
    %228 = arith.subf %204, %217 : vector<8x1xf32>
    %229 = math.exp %228 : vector<8x1xf32>
    %230 = arith.subf %207, %217 : vector<8x1xf32>
    %231 = math.exp %230 : vector<8x1xf32>
    %232 = arith.subf %210, %217 : vector<8x1xf32>
    %233 = math.exp %232 : vector<8x1xf32>
    %234 = arith.addf %219, %221 : vector<8x1xf32>
    %235 = arith.addf %234, %223 : vector<8x1xf32>
    %236 = arith.addf %235, %225 : vector<8x1xf32>
    %237 = arith.addf %236, %227 : vector<8x1xf32>
    %238 = arith.addf %237, %229 : vector<8x1xf32>
    %239 = arith.addf %238, %231 : vector<8x1xf32>
    %240 = arith.addf %239, %233 : vector<8x1xf32>
    %241 = tpu.reciprocal %240 {approx = true} : vector<8x1xf32> -> vector<8x1xf32>
    %242 = vector.broadcast %219 : vector<8x1xf32> to vector<8x32xf32>
    %243 = arith.mulf %242, %163 : vector<8x32xf32>
    %244 = vector.broadcast %221 : vector<8x1xf32> to vector<8x32xf32>
    %245 = arith.mulf %244, %166 : vector<8x32xf32>
    %246 = arith.addf %243, %245 : vector<8x32xf32>
    %247 = vector.broadcast %223 : vector<8x1xf32> to vector<8x32xf32>
    %248 = arith.mulf %247, %169 : vector<8x32xf32>
    %249 = arith.addf %246, %248 : vector<8x32xf32>
    %250 = vector.broadcast %225 : vector<8x1xf32> to vector<8x32xf32>
    %251 = arith.mulf %250, %172 : vector<8x32xf32>
    %252 = arith.addf %249, %251 : vector<8x32xf32>
    %253 = vector.broadcast %227 : vector<8x1xf32> to vector<8x32xf32>
    %254 = arith.mulf %253, %175 : vector<8x32xf32>
    %255 = arith.addf %252, %254 : vector<8x32xf32>
    %256 = vector.broadcast %229 : vector<8x1xf32> to vector<8x32xf32>
    %257 = arith.mulf %256, %178 : vector<8x32xf32>
    %258 = arith.addf %255, %257 : vector<8x32xf32>
    %259 = vector.broadcast %231 : vector<8x1xf32> to vector<8x32xf32>
    %260 = arith.mulf %259, %181 : vector<8x32xf32>
    %261 = arith.addf %258, %260 : vector<8x32xf32>
    %262 = vector.broadcast %233 : vector<8x1xf32> to vector<8x32xf32>
    %263 = arith.mulf %262, %184 : vector<8x32xf32>
    %264 = arith.addf %261, %263 : vector<8x32xf32>
    %265 = vector.broadcast %241 : vector<8x1xf32> to vector<8x32xf32>
    %266 = arith.mulf %264, %265 : vector<8x32xf32>
    %c0_31 = arith.constant 0 : index
    %c0_32 = arith.constant 0 : index
    %267 = vector.load %arg2[%c0_31, %c0_32] : memref<48x128xf32, #tpu.memory_space<vmem>>, vector<8x128xf32>
    %c8 = arith.constant 8 : index
    %c0_33 = arith.constant 0 : index
    %268 = vector.load %arg2[%c8, %c0_33] : memref<48x128xf32, #tpu.memory_space<vmem>>, vector<32x128xf32>
    %c40 = arith.constant 40 : index
    %c0_34 = arith.constant 0 : index
    %269 = vector.load %arg2[%c40, %c0_34] : memref<48x128xf32, #tpu.memory_space<vmem>>, vector<1x128xf32>
    %270 = vector.extract_strided_slice %267 {offsets = [0, 0], sizes = [8, 8], strides = [1, 1]} : vector<8x128xf32> to vector<8x8xf32>
    %271 = vector.extract_strided_slice %267 {offsets = [0, 8], sizes = [8, 8], strides = [1, 1]} : vector<8x128xf32> to vector<8x8xf32>
    %272 = vector.extract_strided_slice %267 {offsets = [0, 16], sizes = [8, 8], strides = [1, 1]} : vector<8x128xf32> to vector<8x8xf32>
    %273 = vector.extract_strided_slice %267 {offsets = [0, 24], sizes = [8, 8], strides = [1, 1]} : vector<8x128xf32> to vector<8x8xf32>
    %274 = vector.extract_strided_slice %268 {offsets = [0, 0], sizes = [32, 32], strides = [1, 1]} : vector<32x128xf32> to vector<32x32xf32>
    %275 = vector.extract_strided_slice %268 {offsets = [0, 32], sizes = [32, 32], strides = [1, 1]} : vector<32x128xf32> to vector<32x32xf32>
    %276 = vector.extract_strided_slice %268 {offsets = [0, 64], sizes = [32, 8], strides = [1, 1]} : vector<32x128xf32> to vector<32x8xf32>
    %277 = vector.extract_strided_slice %268 {offsets = [0, 72], sizes = [32, 8], strides = [1, 1]} : vector<32x128xf32> to vector<32x8xf32>
    %278 = vector.extract_strided_slice %269 {offsets = [0, 0], sizes = [1, 32], strides = [1, 1]} : vector<1x128xf32> to vector<1x32xf32>
    %279 = vector.extract_strided_slice %269 {offsets = [0, 64], sizes = [1, 8], strides = [1, 1]} : vector<1x128xf32> to vector<1x8xf32>
    %cst_35 = arith.constant dense<0.000000e+00> : vector<8x32xf32>
    %280 = tpu.matmul %270, %185, %cst_35 {dimension_numbers = #tpu.dot_dimension_numbers<[1], [0], [0], [1], [0, 0, 1, 1], [], []>} : vector<8x8xf32>, vector<8x32xf32>, vector<8x32xf32> -> vector<8x32xf32>
    %cst_36 = arith.constant dense<0.000000e+00> : vector<8x32xf32>
    %281 = tpu.matmul %271, %186, %cst_36 {dimension_numbers = #tpu.dot_dimension_numbers<[1], [0], [0], [1], [0, 0, 1, 1], [], []>} : vector<8x8xf32>, vector<8x32xf32>, vector<8x32xf32> -> vector<8x32xf32>
    %282 = arith.addf %280, %281 : vector<8x32xf32>
    %cst_37 = arith.constant dense<0.000000e+00> : vector<8x32xf32>
    %283 = tpu.matmul %272, %185, %cst_37 {dimension_numbers = #tpu.dot_dimension_numbers<[1], [0], [0], [1], [0, 0, 1, 1], [], []>} : vector<8x8xf32>, vector<8x32xf32>, vector<8x32xf32> -> vector<8x32xf32>
    %cst_38 = arith.constant dense<0.000000e+00> : vector<8x32xf32>
    %284 = tpu.matmul %273, %186, %cst_38 {dimension_numbers = #tpu.dot_dimension_numbers<[1], [0], [0], [1], [0, 0, 1, 1], [], []>} : vector<8x8xf32>, vector<8x32xf32>, vector<8x32xf32> -> vector<8x32xf32>
    %285 = arith.addf %283, %284 : vector<8x32xf32>
    %cst_39 = arith.constant dense<0.000000e+00> : vector<8x32xf32>
    %286 = tpu.matmul %282, %274, %cst_39 {dimension_numbers = #tpu.dot_dimension_numbers<[1], [0], [0], [1], [0, 0, 1, 1], [], []>} : vector<8x32xf32>, vector<32x32xf32>, vector<8x32xf32> -> vector<8x32xf32>
    %cst_40 = arith.constant dense<0.000000e+00> : vector<8x32xf32>
    %287 = tpu.matmul %285, %275, %cst_40 {dimension_numbers = #tpu.dot_dimension_numbers<[1], [0], [0], [1], [0, 0, 1, 1], [], []>} : vector<8x32xf32>, vector<32x32xf32>, vector<8x32xf32> -> vector<8x32xf32>
    %288 = arith.addf %286, %287 : vector<8x32xf32>
    %289 = vector.broadcast %278 : vector<1x32xf32> to vector<8x32xf32>
    %290 = arith.addf %288, %289 : vector<8x32xf32>
    %cst_41 = arith.constant dense<0.000000e+00> : vector<8x8xf32>
    %291 = tpu.matmul %290, %276, %cst_41 {dimension_numbers = #tpu.dot_dimension_numbers<[1], [0], [0], [1], [0, 0, 1, 1], [], []>} : vector<8x32xf32>, vector<32x8xf32>, vector<8x8xf32> -> vector<8x8xf32>
    %cst_42 = arith.constant dense<0.000000e+00> : vector<8x8xf32>
    %292 = tpu.matmul %266, %277, %cst_42 {dimension_numbers = #tpu.dot_dimension_numbers<[1], [0], [0], [1], [0, 0, 1, 1], [], []>} : vector<8x32xf32>, vector<32x8xf32>, vector<8x8xf32> -> vector<8x8xf32>
    %293 = arith.addf %291, %292 : vector<8x8xf32>
    %294 = vector.broadcast %279 : vector<1x8xf32> to vector<8x8xf32>
    %295 = arith.addf %293, %294 : vector<8x8xf32>
    %296 = arith.negf %295 : vector<8x8xf32>
    %297 = math.exp %296 : vector<8x8xf32>
    %cst_43 = arith.constant 1.000000e+00 : f32
    %298 = vector.broadcast %cst_43 : f32 to vector<8x8xf32>
    %299 = arith.addf %298, %297 : vector<8x8xf32>
    %300 = arith.divf %298, %299 : vector<8x8xf32>
    %c0_44 = arith.constant 0 : index
    %c0_45 = arith.constant 0 : index
    %301 = vector.load %arg3[%c0_44, %c0_45] : memref<8x8xf32, #tpu.memory_space<vmem>>, vector<8x8xf32>
    tpu.vector_store %arg3[%c0_44, %c0_45], %300 {strides = array<i32>} : memref<8x8xf32, #tpu.memory_space<vmem>>, vector<8x8xf32>,
    return
  }
}

</mosaic_0001>

<bundles_post_ra>
// kernel: tpu_custom_call.1
= control target key start
LH: loop header
LB: loop body
LE: loop exit
PB: predicated region body
PF: predicated region fallthrough
CT: control target
= control target key end

     0   :  { %8 = vsyncpa [#allocation3], 0  ;;  %s2926_s0 = inlined_call_operand.vmem [shape: f32[64,32], index: 0, kind: input, shape index: {}]   ;;  %s2927_s1 = inlined_call_operand.hbm [shape: f32[104,256], index: 1, kind: input, shape index: {}]   ;;  %s2928_s2 = inlined_call_operand.vmem [shape: f32[48,128], index: 2, kind: input, shape index: {}]   ;;  %s2929_s3 = inlined_call_operand.hbm [shape: f32[8,8], index: 3, kind: output, shape index: {}]  }
   0x1   :  { %9 = vsyncpa [#allocation4], 0  ;;  %s2449_s12 = smov [#allocation2]   ;;  %s2401_s16 = scalar_lea.hbm %s2927_s1, 3328 }
   0x2   :  { %s17_s13 = sshll.u32 %s2449_s12, 4  ;;  %p2402_p0 = scmp.ne.s32.totalorder %s2927_s1, %s2401_s16  ;;  %s18_s13 = int_to_ptr.vmem [resolvable:$true] %s17_s13 }
   0x3   :  { %p2405_p1 = scmp.lt.u32.totalorder %s2401_s16, %s2927_s1 }
   0x5   :  { %p2407_p2 = pnand %p2405_p1, %p2402_p0 }
   0x7   :  { %2410 = shalt.err (!%p2407_p2)
}
   0x8   :  { %s2411_s21 = scalar_lea.vmem %s18_s13, 3328  ;;  %p2416_p4 = scmp.lt.s32.totalorder %s18_s13, %s18_s13 }
   0x9   :  { %p2412_p3 = scmp.ne.s32.totalorder %s18_s13, %s2411_s21  ;;  %p2417_p5 = scmp.lt.s32.totalorder %s2411_s21, %s2411_s21 }
   0xb   :  { %p2418_p6 = por %p2417_p5, %p2416_p4 }
   0xd   :  { %p2419_p7 = pnand %p2418_p6, %p2412_p3 }
   0xf   :  { %2422 = shalt.err (!%p2419_p7)
}
  0x10   :  { %s2450_s22 = smov 256   ;;  %s2451_s23 = smov 16  }
  0x11   :  { %23 = dma.hbm_to_vmem [thread:$0]  %s2927_s1, 3328, %s18_s13, [#allocation3], %s2450_s22, %s2450_s22, %s2451_s23  }
  0x12   :  { %2445 = dma.done.wait [#allocation3], 3328  }
  0x13   :  { %2446 = vsyncadd [#allocation3], 4294963968  ;;  %v2452_v0 = vmov 0.0   ;;  %v30_v1 = vld [vmem:[#allocation2 + $0x8] sm:$0xff]  ;;  %v32_v2 = vld [vmem:[#allocation2 + $0x18] sm:$0xff]  ;;  %vm74_vm0 = vcmask 261120   ;;  %v64_v51 = vlaneseq }
  0x14   :  { %163 = vmatprep.mubr.f32.mxu1 %v2452_v0  ;;  %492 = vmatprep.mubr.f32.mxu0 %v2452_v0  ;;  %v29_v3 = vld [vmem:[#allocation2] sm:$0xff]  ;;  %v2044_v4 = vpack.c.bf16 %v32_v2, %v30_v1  ;;  %v31_v5 = vld [vmem:[#allocation2 + $0x10] sm:$0xff]  ;;  %v34_v6 = vld [vmem:[#allocation2 + $0x28] sm:$0xff]  ;;  %vm212_vm1 = vcmask 523264   ;;  %s2454_s16 = smov 104   ;;  %s2455_s17 = smov 120  }
  0x15   :  { %v36_v7 = vld [vmem:[#allocation2 + $0x38] sm:$0xff]  ;;  %v2046_v8 = vpack.c.bf16 %v31_v5, %v29_v3  ;;  %v33_v10 = vld [vmem:[#allocation2 + $0x20] sm:$0xff]  ;;  %v35_v11 = vld [vmem:[#allocation2 + $0x30] sm:$0xff]  ;;  %v65_v54 = vshrl.u32 %v64_v51, 7  ;;  %vm2456_vm2 = vmmov 0   ;;  %s2457_s18 = smov 96  }
  0x16   :  { %v2048_v9 = vpack.c.bf16 %v36_v7, %v34_v6  ;;  %2045 = vmatprep.subr.bf16.mxu1 %v2044_v4  ;;  %v38_v12 = vld [vmem:[#allocation2 + $0x48] sm:$0xff]  ;;  %v40_v13 = vld [vmem:[#allocation2 + $0x58] sm:$0xff]  ;;  %v37_v14 = vld [vmem:[#allocation2 + $0x40] sm:$0xff]  ;;  %v2050_v15 = vpack.c.bf16 %v35_v11, %v33_v10  ;;  %vm1254_vm3 = vcmask 64512   ;;  %s2458_s23 = smov 112   ;;  %s2459_s27 = smov 32  }
  0x17   :  { %2047 = vmatpush1.bf16.msra.mxu1 %v2046_v8  ;;  %v2497_v16 = vpack.c.bf16 %v40_v13, %v38_v12  ;;  %v39_v17 = vld [vmem:[#allocation2 + $0x50] sm:$0xff]  ;;  %v42_v19 = vld [vmem:[#allocation2 + $0x68] sm:$0xff]  ;;  %v44_v20 = vld [vmem:[#allocation2 + $0x78] sm:$0xff]  ;;  %v70_v57 = vsub.s32 1, %v65_v54  ;;  %v66_v3 = vsub.s32 0, %v65_v54  ;;  %s2461_s28 = smov 56  }
  0x18   :  { %2049 = vmatprep.subr.bf16.mxu1 %v2048_v9  ;;  %v2499_v18 = vpack.c.bf16 %v39_v17, %v37_v14  ;;  %v2501_v21 = vpack.c.bf16 %v44_v20, %v42_v19  ;;  %v41_v22 = vld [vmem:[#allocation2 + $0x60] sm:$0xff]  ;;  %v43_v23 = vld [vmem:[#allocation2 + $0x70] sm:$0xff]  ;;  %v46_v25 = vld [vmem:[#allocation2 + $0x88] sm:$0xff] }
  0x19   :  { %2085 = vmatprep.subr.bf16.mxu0 %v2497_v16  ;;  %v55_v24 = vld [vmem:[%s2926_s0] sm:$0xff]  ;;  %v48_v26 = vld [vmem:[#allocation2 + $0x98] sm:$0xff]  ;;  %v2510_v27 = vpack.c.bf16 %v43_v23, %v41_v22  ;;  %v45_v28 = vld [vmem:[#allocation2 + $0x80] sm:$0xff] }
  0x1a   :  { %2087 = vmatpush1.bf16.msra.mxu0 %v2499_v18  ;;  %v47_v29 = vld [vmem:[#allocation2 + $0x90] sm:$0xff]  ;;  %v2513_v30 = vpack.c.bf16 %v48_v26, %v46_v25  ;;  %v56_v31 = vld [vmem:[%s2926_s0 + $0x8] sm:$0xff]  ;;  %v50_v32 = vld [vmem:[#allocation2 + $0xa8] sm:$0xff] }
  0x1b   :  { %2051 = vmatpush1.bf16.msra.mxu1 %v2050_v15  ;;  %2089 = vmatprep.subr.bf16.mxu0 %v2501_v21  ;;  %v52_v33 = vld [vmem:[#allocation2 + $0xb8] sm:$0xff]  ;;  %v2522_v34 = vpack.c.bf16 %v47_v29, %v45_v28  ;;  %v49_v35 = vld [vmem:[#allocation2 + $0xa0] sm:$0xff]  ;;  %v51_v36 = vld [vmem:[#allocation2 + $0xb0] sm:$0xff] }
  0x1c   :  { %2053 = vmatprep.subr.bf16.mxu1 %v2497_v16  ;;  %v2526_v37 = vpack.c.bf16 %v52_v33, %v50_v32  ;;  %v57_v38 = vld [vmem:[%s2926_s0 + $0x10] sm:$0xff]  ;;  %v2535_v39 = vpack.c.bf16 %v51_v36, %v49_v35  ;;  %v58_v40 = vld [vmem:[%s2926_s0 + $0x18] sm:$0xff]  ;;  %v59_v41 = vld [vmem:[%s2926_s0 + $0x20] sm:$0xff] }
  0x1d   :  { %v60_v42 = vld [vmem:[%s2926_s0 + $0x28] sm:$0xff]  ;;  %v61_v43 = vld [vmem:[%s2926_s0 + $0x30] sm:$0xff]  ;;  %v62_v44 = vld [vmem:[%s2926_s0 + $0x38] sm:$0xff]  ;;  %s2453_s0 = smov 64  }
  0x1e   :  { %1911 = vmatmul.mubr.msk.f32.vlgmr.msra.gmra.mrb[0].mxu1 %vm74_vm0, %v55_v24  ;;  %2091 = vmatpush1.bf16.msra.mxu0 %v2510_v27  ;;  %v54_v59 = vld [vmem:[#allocation2 + $0xc0] ss:$8 sm:$0x3] }
  0x1f   :  { %2055 = vmatpush1.bf16.msra.mxu1 %v2499_v18  ;;  %169 = vmatprep.mubr.f32.mxu1 %v2452_v0  ;;  %v2605_v61 = vrot.slane %v54_v59, %v70_v57  ;;  %v2609_v4 = vrot.slane %v54_v59, %v66_v3 }
  0x20   :  { %2057 = vmatprep.subr.bf16.mxu1 %v2501_v21  ;;  %2093 = vmatprep.subr.bf16.mxu0 %v2513_v30 }
  0x22   :  { %1912 = vmatmul.mubr.msk.f32.gmra.mrb[2].mxu1 %vm74_vm0, %v56_v31  ;;  %2095 = vmatpush1.bf16.msra.mxu0 %v2522_v34 }
  0x23   :  { %175 = vmatprep.mubr.f32.mxu1 %v2452_v0  ;;  %2059 = vmatpush1.bf16.msra.mxu1 %v2510_v27 }
  0x24   :  { %2061 = vmatprep.subr.bf16.mxu1 %v2513_v30  ;;  %2097 = vmatprep.subr.bf16.mxu0 %v2526_v37 }
  0x26   :  { %1913 = vmatmul.mubr.msk.f32.gmra.mrb[4].mxu1 %vm74_vm0, %v57_v38  ;;  %2099 = vmatpush1.bf16.msra.mxu0 %v2535_v39 }
  0x27   :  { %181 = vmatprep.mubr.f32.mxu1 %v2452_v0  ;;  %2063 = vmatpush1.bf16.msra.mxu1 %v2522_v34 }
  0x28   :  { %2065 = vmatprep.subr.bf16.mxu1 %v2526_v37  ;;  %2101 = vmatprep.subr.bf16.mxu0 %v2497_v16 }
  0x2a   :  { %1914 = vmatmul.mubr.msk.f32.gmra.mrb[6].mxu1 %vm74_vm0, %v58_v40 }
  0x2b   :  { %187 = vmatprep.mubr.f32.mxu1 %v2452_v0  ;;  %2067 = vmatpush1.bf16.msra.mxu1 %v2535_v39 }
  0x2c   :  { %2069 = vmatprep.subr.bf16.mxu1 %v2497_v16 }
  0x2e   :  { %1915 = vmatmul.mubr.msk.f32.gmra.mrb[8].mxu1 %vm74_vm0, %v59_v41 }
  0x2f   :  { %193 = vmatprep.mubr.f32.mxu1 %v2452_v0 }
  0x32   :  { %1916 = vmatmul.mubr.msk.f32.gmra.mrb[10].mxu1 %vm74_vm0, %v60_v42 }
  0x33   :  { %199 = vmatprep.mubr.f32.mxu1 %v2452_v0 }
  0x36   :  { %1917 = vmatmul.mubr.msk.f32.gmra.mrb[12].mxu1 %vm74_vm0, %v61_v43 }
  0x37   :  { %205 = vmatprep.mubr.f32.mxu1 %v2452_v0 }
  0x3a   :  { %1918 = vmatmul.mubr.msk.f32.gmra.mrb[14].mxu1 %vm74_vm0, %v62_v44 }
  0x3b   :  { %280 = vmatprep.mubr.f32.mxu1 %v2452_v0 }
  0x3e   :  { %281 = vmatmul.mubr.f32.vlgmr.msra.gmra.mrb[0].mxu1 %v2452_v0 }
  0x3f   :  { %2071 = vmatpush1.bf16.msra.mxu1 %v2499_v18  ;;  %386 = vmatprep.mubr.f32.mxu1 %v2452_v0 }
  0x40   :  { %2073 = vmatprep.subr.bf16.mxu1 %v2501_v21 }
  0x43   :  { %2075 = vmatpush1.bf16.msra.mxu1 %v2510_v27 }
  0x44   :  { %2077 = vmatprep.subr.bf16.mxu1 %v2513_v30 }
  0x47   :  { %2079 = vmatpush1.bf16.msra.mxu1 %v2522_v34 }
  0x48   :  { %2081 = vmatprep.subr.bf16.mxu1 %v2526_v37 }
  0x4b   :  { %2083 = vmatpush1.bf16.msra.mxu1 %v2535_v39 }
  0x4c   :  { %1985 = vmatprep.subr.mxu1 %v2452_v0 }
  0xf9   :  { %v2581_v45 = vpop.f32.mrb[4].mxu1 }
  0xfa   :  { %v2583_v46 = vpop.f32.mrb[5].mxu1 }
  0xfd   :  { %v2585_v47 = vpop.f32.mrb[6].mxu1 }
  0xfe   :  { %v2587_v48 = vpop.f32.mrb[7].mxu1 }
 0x101   :  { %v2589_v49 = vpop.f32.mrb[8].mxu1 }
 0x102   :  { %v2591_v50 = vpop.f32.mrb[9].mxu1 }
 0x105   :  { %v2593_v52 = vpop.f32.mrb[10].mxu1 }
 0x106   :  { %v2595_v53 = vpop.f32.mrb[11].mxu1 }
 0x109   :  { %v2597_v55 = vpop.f32.mrb[12].mxu1 }
 0x10a   :  { %v2599_v56 = vpop.f32.mrb[13].mxu1 }
 0x10d   :  { %v2601_v58 = vpop.f32.mrb[14].mxu1 }
 0x10e   :  { %v2603_v60 = vpop.f32.mrb[15].mxu1 }
 0x111   :  { %v282_v62 = vpop.f32.mrb[0].mxu1 }
 0x112   :  { %v284_v63 = vpop.f32.mrb[1].mxu1  ;;  %v2204_v5 = vadd.f32 %v282_v62, %v2609_v4 }
 0x113   :  { %v2205_v1 = vadd.f32 %v284_v63, %v2605_v61 }
 0x114   :  { %v1919_v6 = vmul.f32 -1.442695, %v2204_v5 }
 0x115   :  { %2283 = vtanh.f32 %v2205_v1  ;;  %v1920_v17 = vmul.f32 -1.442695, %v2205_v1  ;;  %v178_v1 = vadd.f32 %v2581_v45, %v2609_v4 }
 0x116   :  { %2285 = vpow2.f32 %v1919_v6 }
 0x11f   :  { %v2284_v2 = vpop.eup %2283 }
 0x120   :  { %304 = vrot.lane.b32.xlu0 %v2284_v2, %s2453_s0  ;;  %v2286_v7 = vpop.eup %2285  ;;  %v180_v2 = vadd.f32 %v2583_v46, %v2605_v61 }
 0x121   :  { %v295_v8 = vadd.f32 1.0, %v2286_v7 }
 0x123   :  { %2287 = vrcp.f32 %v295_v8 }
 0x12d   :  { %v2288_v9 = vpop.eup %2287 }
 0x12e   :  { %v302_v12 = vmul.f32 0.0, %v2288_v9 }
 0x192   :  { %v305_v10 = vpop.permute.xlu0 %304 }
 0x193   :  { %v307_v11 = vmul.f32 %v2288_v9, %v305_v10 }
 0x195   :  { %309 = vrot.lane.b32.xlu0 %v307_v11, %s2453_s0 }
 0x207   :  { %v310_v13 = vpop.permute.xlu0 %309 }
 0x208   :  { %v312_v14 = vadd.f32 %v310_v13, %v302_v12 }
 0x20a   :  { %2289 = vtanh.f32 %v312_v14 }
 0x20b   :  { %2291 = vpow2.f32 %v1920_v17 }
 0x214   :  { %v2290_v15 = vpop.eup %2289 }
 0x215   :  { %315 = vrot.lane.b32.xlu1 %v2290_v15, %s2453_s0  ;;  %v2292_v19 = vpop.eup %2291 }
 0x216   :  { %v296_v20 = vadd.f32 1.0, %v2292_v19 }
 0x218   :  { %2293 = vrcp.f32 %v296_v20 }
 0x222   :  { %v2294_v22 = vpop.eup %2293 }
 0x287   :  { %v316_v23 = vpop.permute.xlu1 %315 }
 0x288   :  { %v2614_v24 = vmul.f32 %v2294_v22, %v316_v23 }
 0x28a   :  { %1921 = vmatmul.mubr.msk.f32.vlgmr.msra.gmra.mrb[2].mxu1 %vm212_vm1, %v2614_v24 }
 0x28b   :  { %1987 = vmatprep.mubr.msk.f32.mxu1 %vm2456_vm2, %v2452_v0 }
 0x35d   :  { %v388_v25 = vpop.f32.mrb[2].mxu1 }
 0x35e   :  { %v390_v26 = vpop.f32.mrb[3].mxu1  ;;  %v2206_v31 = vadd.f32 %v388_v25, %v2609_v4 }
 0x35f   :  { %v2207_v28 = vadd.f32 %v390_v26, %v2605_v61 }
 0x360   :  { %v1922_v32 = vmul.f32 -1.442695, %v2206_v31 }
 0x361   :  { %2295 = vtanh.f32 %v2207_v28  ;;  %v1923_v51 = vmul.f32 -1.442695, %v2207_v28  ;;  %v184_v28 = vadd.f32 %v2585_v47, %v2609_v4 }
 0x362   :  { %2297 = vpow2.f32 %v1922_v32 }
 0x36b   :  { %v2296_v29 = vpop.eup %2295 }
 0x36c   :  { %410 = vrot.lane.b32.xlu1 %v2296_v29, %s2453_s0  ;;  %v2298_v33 = vpop.eup %2297  ;;  %v186_v29 = vadd.f32 %v2587_v48, %v2605_v61 }
 0x36d   :  { %v401_v35 = vadd.f32 1.0, %v2298_v33 }
 0x36f   :  { %2299 = vrcp.f32 %v401_v35 }
 0x379   :  { %v2300_v36 = vpop.eup %2299 }
 0x37a   :  { %v408_v41 = vmul.f32 %v2300_v36, %v312_v14 }
 0x3de   :  { %v411_v38 = vpop.permute.xlu1 %410 }
 0x3df   :  { %v413_v40 = vmul.f32 %v2300_v36, %v411_v38 }
 0x3e1   :  { %415 = vrot.lane.b32.xlu0 %v413_v40, %s2453_s0 }
 0x453   :  { %v416_v42 = vpop.permute.xlu0 %415 }
 0x454   :  { %v418_v43 = vadd.f32 %v416_v42, %v408_v41 }
 0x456   :  { %2301 = vtanh.f32 %v418_v43 }
 0x457   :  { %2303 = vpow2.f32 %v1923_v51 }
 0x460   :  { %v2302_v44 = vpop.eup %2301 }
 0x461   :  { %421 = vrot.lane.b32.xlu1 %v2302_v44, %s2453_s0  ;;  %v2304_v54 = vpop.eup %2303 }
 0x462   :  { %v402_v57 = vadd.f32 1.0, %v2304_v54 }
 0x464   :  { %2305 = vrcp.f32 %v402_v57 }
 0x46e   :  { %v2306_v59 = vpop.eup %2305 }
 0x4d3   :  { %v422_v62 = vpop.permute.xlu1 %421 }
 0x4d4   :  { %v2623_v63 = vmul.f32 %v2306_v59, %v422_v62 }
 0x4d6   :  { %1924 = vmatmul.mubr.msk.f32.vlgmr.msra.gmra.mrb[0].mxu0 %vm212_vm1, %v2623_v63 }
 0x4d7   :  { %2103 = vmatpush1.bf16.msra.mxu0 %v2499_v18  ;;  %598 = vmatprep.mubr.f32.mxu0 %v2452_v0 }
 0x4d8   :  { %2105 = vmatprep.subr.bf16.mxu0 %v2501_v21 }
 0x4db   :  { %2107 = vmatpush1.bf16.msra.mxu0 %v2510_v27 }
 0x4dc   :  { %2109 = vmatprep.subr.bf16.mxu0 %v2513_v30 }
 0x4df   :  { %2111 = vmatpush1.bf16.msra.mxu0 %v2522_v34 }
 0x4e0   :  { %2113 = vmatprep.subr.bf16.mxu0 %v2526_v37 }
 0x4e3   :  { %2115 = vmatpush1.bf16.msra.mxu0 %v2535_v39 }
 0x4e4   :  { %2117 = vmatprep.subr.bf16.mxu0 %v2497_v16 }
 0x5a9   :  { %v494_v3 = vpop.f32.mrb[0].mxu0 }
 0x5aa   :  { %v499_v5 = vadd.f32 %v494_v3, %v178_v1  ;;  %v496_v6 = vpop.f32.mrb[1].mxu0 }
 0x5ab   :  { %v500_v7 = vadd.f32 %v496_v6, %v180_v2  ;;  %v192_v6 = vadd.f32 %v2591_v50, %v2605_v61 }
 0x5ac   :  { %v1925_v9 = vmul.f32 -1.442695, %v499_v5  ;;  %v190_v5 = vadd.f32 %v2589_v49, %v2609_v4 }
 0x5ad   :  { %2307 = vtanh.f32 %v500_v7  ;;  %v1926_v19 = vmul.f32 -1.442695, %v500_v7 }
 0x5ae   :  { %2309 = vpow2.f32 %v1925_v9 }
 0x5b7   :  { %v2308_v8 = vpop.eup %2307 }
 0x5b8   :  { %516 = vrot.lane.b32.xlu0 %v2308_v8, %s2453_s0  ;;  %v2310_v10 = vpop.eup %2309 }
 0x5b9   :  { %v507_v11 = vadd.f32 1.0, %v2310_v10 }
 0x5bb   :  { %2311 = vrcp.f32 %v507_v11 }
 0x5c5   :  { %v2312_v12 = vpop.eup %2311 }
 0x5c6   :  { %v514_v45 = vmul.f32 %v2312_v12, %v418_v43 }
 0x62a   :  { %v517_v13 = vpop.permute.xlu0 %516 }
 0x62b   :  { %v519_v14 = vmul.f32 %v2312_v12, %v517_v13 }
 0x62d   :  { %521 = vrot.lane.b32.xlu1 %v519_v14, %s2453_s0 }
 0x69f   :  { %v522_v46 = vpop.permute.xlu1 %521 }
 0x6a0   :  { %v524_v15 = vadd.f32 %v522_v46, %v514_v45 }
 0x6a2   :  { %2313 = vtanh.f32 %v524_v15 }
 0x6a3   :  { %2315 = vpow2.f32 %v1926_v19 }
 0x6ac   :  { %v2314_v17 = vpop.eup %2313 }
 0x6ad   :  { %527 = vrot.lane.b32.xlu0 %v2314_v17, %s2453_s0  ;;  %v2316_v20 = vpop.eup %2315 }
 0x6ae   :  { %v508_v22 = vadd.f32 1.0, %v2316_v20 }
 0x6b0   :  { %2317 = vrcp.f32 %v508_v22 }
 0x6ba   :  { %v2318_v23 = vpop.eup %2317 }
 0x71f   :  { %v528_v25 = vpop.permute.xlu0 %527 }
 0x720   :  { %v2643_v26 = vmul.f32 %v2318_v23, %v528_v25 }
 0x722   :  { %1927 = vmatmul.mubr.msk.f32.vlgmr.msra.gmra.mrb[2].mxu0 %vm212_vm1, %v2643_v26 }
 0x723   :  { %2119 = vmatpush1.bf16.msra.mxu0 %v2499_v18  ;;  %704 = vmatprep.mubr.f32.mxu0 %v2452_v0 }
 0x724   :  { %2121 = vmatprep.subr.bf16.mxu0 %v2501_v21 }
 0x727   :  { %2123 = vmatpush1.bf16.msra.mxu0 %v2510_v27 }
 0x728   :  { %2125 = vmatprep.subr.bf16.mxu0 %v2513_v30 }
 0x72b   :  { %2127 = vmatpush1.bf16.msra.mxu0 %v2522_v34 }
 0x72c   :  { %2129 = vmatprep.subr.bf16.mxu0 %v2526_v37 }
 0x72f   :  { %2131 = vmatpush1.bf16.msra.mxu0 %v2535_v39 }
 0x730   :  { %2133 = vmatprep.subr.bf16.mxu0 %v2497_v16 }
 0x7f5   :  { %v600_v31 = vpop.f32.mrb[2].mxu0 }
 0x7f6   :  { %v605_v32 = vadd.f32 %v600_v31, %v184_v28  ;;  %v602_v33 = vpop.f32.mrb[3].mxu0  ;;  %v196_v31 = vadd.f32 %v2593_v52, %v2609_v4 }
 0x7f7   :  { %v606_v35 = vadd.f32 %v602_v33, %v186_v29 }
 0x7f8   :  { %v1928_v38 = vmul.f32 -1.442695, %v605_v32  ;;  %v198_v32 = vadd.f32 %v2595_v53, %v2605_v61 }
 0x7f9   :  { %2319 = vtanh.f32 %v606_v35  ;;  %v1929_v57 = vmul.f32 -1.442695, %v606_v35 }
 0x7fa   :  { %2321 = vpow2.f32 %v1928_v38 }
 0x803   :  { %v2320_v36 = vpop.eup %2319 }
 0x804   :  { %622 = vrot.lane.b32.xlu1 %v2320_v36, %s2453_s0  ;;  %v2322_v40 = vpop.eup %2321 }
 0x805   :  { %v613_v41 = vadd.f32 1.0, %v2322_v40 }
 0x807   :  { %2323 = vrcp.f32 %v613_v41 }
 0x811   :  { %v2324_v42 = vpop.eup %2323 }
 0x812   :  { %v620_v47 = vmul.f32 %v2324_v42, %v524_v15 }
 0x876   :  { %v623_v43 = vpop.permute.xlu1 %622 }
 0x877   :  { %v625_v44 = vmul.f32 %v2324_v42, %v623_v43 }
 0x879   :  { %627 = vrot.lane.b32.xlu0 %v625_v44, %s2453_s0 }
 0x8eb   :  { %v628_v48 = vpop.permute.xlu0 %627 }
 0x8ec   :  { %v630_v51 = vadd.f32 %v628_v48, %v620_v47 }
 0x8ee   :  { %2325 = vtanh.f32 %v630_v51 }
 0x8ef   :  { %2327 = vpow2.f32 %v1929_v57 }
 0x8f8   :  { %v2326_v54 = vpop.eup %2325 }
 0x8f9   :  { %633 = vrot.lane.b32.xlu1 %v2326_v54, %s2453_s0  ;;  %v2328_v59 = vpop.eup %2327 }
 0x8fa   :  { %v614_v62 = vadd.f32 1.0, %v2328_v59 }
 0x8fc   :  { %2329 = vrcp.f32 %v614_v62 }
 0x906   :  { %v2330_v1 = vpop.eup %2329 }
 0x96b   :  { %v634_v2 = vpop.permute.xlu1 %633 }
 0x96c   :  { %v2663_v3 = vmul.f32 %v2330_v1, %v634_v2 }
 0x96e   :  { %1930 = vmatmul.mubr.msk.f32.vlgmr.msra.gmra.mrb[4].mxu0 %vm212_vm1, %v2663_v3 }
 0x96f   :  { %2135 = vmatpush1.bf16.msra.mxu0 %v2499_v18  ;;  %810 = vmatprep.mubr.f32.mxu0 %v2452_v0 }
 0x970   :  { %2137 = vmatprep.subr.bf16.mxu0 %v2501_v21 }
 0x973   :  { %2139 = vmatpush1.bf16.msra.mxu0 %v2510_v27 }
 0x974   :  { %2141 = vmatprep.subr.bf16.mxu0 %v2513_v30 }
 0x977   :  { %2143 = vmatpush1.bf16.msra.mxu0 %v2522_v34 }
 0x978   :  { %2145 = vmatprep.subr.bf16.mxu0 %v2526_v37 }
 0x97b   :  { %2147 = vmatpush1.bf16.msra.mxu0 %v2535_v39 }
 0x97c   :  { %2149 = vmatprep.subr.bf16.mxu0 %v2497_v16 }
 0xa41   :  { %v706_v7 = vpop.f32.mrb[4].mxu0 }
 0xa42   :  { %v711_v8 = vadd.f32 %v706_v7, %v190_v5  ;;  %v708_v9 = vpop.f32.mrb[5].mxu0  ;;  %v202_v5 = vadd.f32 %v2597_v55, %v2609_v4 }
 0xa43   :  { %v712_v10 = vadd.f32 %v708_v9, %v192_v6 }
 0xa44   :  { %v1931_v12 = vmul.f32 -1.442695, %v711_v8 }
 0xa45   :  { %2331 = vtanh.f32 %v712_v10  ;;  %v1932_v20 = vmul.f32 -1.442695, %v712_v10 }
 0xa46   :  { %2333 = vpow2.f32 %v1931_v12 }
 0xa4f   :  { %v2332_v11 = vpop.eup %2331 }
 0xa50   :  { %728 = vrot.lane.b32.xlu0 %v2332_v11, %s2453_s0  ;;  %v2334_v13 = vpop.eup %2333 }
 0xa51   :  { %v719_v14 = vadd.f32 1.0, %v2334_v13 }
 0xa53   :  { %2335 = vrcp.f32 %v719_v14 }
 0xa5d   :  { %v2336_v45 = vpop.eup %2335 }
 0xa5e   :  { %v726_v49 = vmul.f32 %v2336_v45, %v630_v51 }
 0xac2   :  { %v729_v46 = vpop.permute.xlu0 %728 }
 0xac3   :  { %v731_v15 = vmul.f32 %v2336_v45, %v729_v46 }
 0xac5   :  { %733 = vrot.lane.b32.xlu1 %v731_v15, %s2453_s0 }
 0xb37   :  { %v734_v50 = vpop.permute.xlu1 %733 }
 0xb38   :  { %v736_v17 = vadd.f32 %v734_v50, %v726_v49  ;;  %v208_v50 = vadd.f32 %v2601_v58, %v2609_v4 }
 0xb3a   :  { %2337 = vtanh.f32 %v736_v17 }
 0xb3b   :  { %2339 = vpow2.f32 %v1932_v20 }
 0xb44   :  { %v2338_v19 = vpop.eup %2337 }
 0xb45   :  { %739 = vrot.lane.b32.xlu0 %v2338_v19, %s2453_s0  ;;  %v2340_v22 = vpop.eup %2339 }
 0xb46   :  { %v720_v23 = vadd.f32 1.0, %v2340_v22 }
 0xb48   :  { %2341 = vrcp.f32 %v720_v23 }
 0xb52   :  { %v2342_v25 = vpop.eup %2341 }
 0xbb7   :  { %v740_v28 = vpop.permute.xlu0 %739 }
 0xbb8   :  { %v2683_v29 = vmul.f32 %v2342_v25, %v740_v28 }
 0xbba   :  { %1933 = vmatmul.mubr.msk.f32.vlgmr.msra.gmra.mrb[6].mxu0 %vm212_vm1, %v2683_v29 }
 0xbbb   :  { %2151 = vmatpush1.bf16.msra.mxu0 %v2499_v18  ;;  %916 = vmatprep.mubr.f32.mxu0 %v2452_v0 }
 0xbbc   :  { %2153 = vmatprep.subr.bf16.mxu0 %v2501_v21 }
 0xbbf   :  { %2155 = vmatpush1.bf16.msra.mxu0 %v2510_v27 }
 0xbc0   :  { %2157 = vmatprep.subr.bf16.mxu0 %v2513_v30 }
 0xbc3   :  { %2159 = vmatpush1.bf16.msra.mxu0 %v2522_v34 }
 0xbc4   :  { %2161 = vmatprep.subr.bf16.mxu0 %v2526_v37 }
 0xbc7   :  { %2163 = vmatpush1.bf16.msra.mxu0 %v2535_v39 }
 0xbc8   :  { %2165 = vmatprep.subr.bf16.mxu0 %v2497_v16 }
 0xc8d   :  { %v812_v33 = vpop.f32.mrb[6].mxu0 }
 0xc8e   :  { %v817_v35 = vadd.f32 %v812_v33, %v196_v31  ;;  %v814_v36 = vpop.f32.mrb[7].mxu0 }
 0xc8f   :  { %v818_v38 = vadd.f32 %v814_v36, %v198_v32 }
 0xc90   :  { %v1934_v41 = vmul.f32 -1.442695, %v817_v35 }
 0xc91   :  { %2343 = vtanh.f32 %v818_v38  ;;  %v1935_v54 = vmul.f32 -1.442695, %v818_v38  ;;  %v1245_v38 = vld [vmem:[%s2928_s2] sm:$0xff] }
 0xc92   :  { %2345 = vpow2.f32 %v1934_v41  ;;  %v2753_v41 = vld [vmem:[%s2928_s2 + $0x10] sm:$0xff] }
 0xc9b   :  { %v2344_v40 = vpop.eup %2343 }
 0xc9c   :  { %834 = vrot.lane.b32.xlu1 %v2344_v40, %s2453_s0  ;;  %v2346_v42 = vpop.eup %2345  ;;  %v2748_v40 = vld [vmem:[%s2928_s2 + $0x8] sm:$0xff] }
 0xc9d   :  { %v825_v43 = vadd.f32 1.0, %v2346_v42  ;;  %v2759_v42 = vpack.i.bf16 %v2753_v41, %v2748_v40 }
 0xc9f   :  { %2347 = vrcp.f32 %v825_v43 }
 0xca9   :  { %v2348_v16 = vpop.eup %2347 }
 0xcaa   :  { %v832_v52 = vmul.f32 %v2348_v16, %v736_v17  ;;  %v210_v17 = vadd.f32 %v2603_v60, %v2605_v61 }
 0xd0e   :  { %v835_v44 = vpop.permute.xlu1 %834 }
 0xd0f   :  { %v837_v47 = vmul.f32 %v2348_v16, %v835_v44 }
 0xd11   :  { %839 = vrot.lane.b32.xlu0 %v837_v47, %s2453_s0 }
 0xd83   :  { %v840_v53 = vpop.permute.xlu0 %839 }
 0xd84   :  { %v842_v48 = vadd.f32 %v840_v53, %v832_v52 }
 0xd86   :  { %2349 = vtanh.f32 %v842_v48 }
 0xd87   :  { %2351 = vpow2.f32 %v1935_v54 }
 0xd90   :  { %v2350_v51 = vpop.eup %2349 }
 0xd91   :  { %845 = vrot.lane.b32.xlu1 %v2350_v51, %s2453_s0  ;;  %v2352_v57 = vpop.eup %2351  ;;  %v2786_v51 = vld [vmem:[%s2928_s2 + $0x20] sm:$0xff] }
 0xd92   :  { %v826_v59 = vadd.f32 1.0, %v2352_v57 }
 0xd94   :  { %2353 = vrcp.f32 %v826_v59 }
 0xd9e   :  { %v2354_v62 = vpop.eup %2353 }
 0xe03   :  { %v846_v1 = vpop.permute.xlu1 %845 }
 0xe04   :  { %v2703_v2 = vmul.f32 %v2354_v62, %v846_v1 }
 0xe06   :  { %1936 = vmatmul.mubr.msk.f32.vlgmr.msra.gmra.mrb[8].mxu0 %vm212_vm1, %v2703_v2 }
 0xe07   :  { %2167 = vmatpush1.bf16.msra.mxu0 %v2499_v18  ;;  %1022 = vmatprep.mubr.f32.mxu0 %v2452_v0  ;;  %v204_v18 = vadd.f32 %v2599_v56, %v2605_v61 }
 0xe08   :  { %2169 = vmatprep.subr.bf16.mxu0 %v2501_v21 }
 0xe0b   :  { %2171 = vmatpush1.bf16.msra.mxu0 %v2510_v27 }
 0xe0c   :  { %2173 = vmatprep.subr.bf16.mxu0 %v2513_v30 }
 0xe0f   :  { %2175 = vmatpush1.bf16.msra.mxu0 %v2522_v34 }
 0xe10   :  { %2177 = vmatprep.subr.bf16.mxu0 %v2526_v37 }
 0xe13   :  { %2179 = vmatpush1.bf16.msra.mxu0 %v2535_v39 }
 0xe14   :  { %1980 = vmatprep.subr.mxu0 %v2452_v0 }
 0xed9   :  { %v918_v6 = vpop.f32.mrb[8].mxu0 }
 0xeda   :  { %v923_v21 = vadd.f32 %v918_v6, %v202_v5  ;;  %v920_v7 = vpop.f32.mrb[9].mxu0 }
 0xedb   :  { %v924_v27 = vadd.f32 %v920_v7, %v204_v18 }
 0xedc   :  { %v1937_v34 = vmul.f32 -1.442695, %v923_v21 }
 0xedd   :  { %2355 = vtanh.f32 %v924_v27  ;;  %v1938_v13 = vmul.f32 -1.442695, %v924_v27 }
 0xede   :  { %2357 = vpow2.f32 %v1937_v34  ;;  %v2460_v34 = vmov 0.0|0.0  }
 0xee7   :  { %v2356_v30 = vpop.eup %2355 }
 0xee8   :  { %940 = vrot.lane.b32.xlu0 %v2356_v30, %s2453_s0  ;;  %v2358_v37 = vpop.eup %2357 }
 0xee9   :  { %v931_v39 = vadd.f32 1.0, %v2358_v37 }
 0xeeb   :  { %2359 = vrcp.f32 %v931_v39 }
 0xef5   :  { %v2360_v8 = vpop.eup %2359 }
 0xef6   :  { %v938_v55 = vmul.f32 %v2360_v8, %v842_v48  ;;  %v2781_v48 = vld [vmem:[%s2928_s2 + $0x18] sm:$0xff] }
 0xef7   :  { %v2792_v54 = vpack.i.bf16 %v2786_v51, %v2781_v48 }
 0xf5a   :  { %v941_v9 = vpop.permute.xlu0 %940 }
 0xf5b   :  { %v943_v10 = vmul.f32 %v2360_v8, %v941_v9 }
 0xf5d   :  { %945 = vrot.lane.b32.xlu1 %v943_v10, %s2453_s0 }
 0xfcf   :  { %v946_v56 = vpop.permute.xlu1 %945 }
 0xfd0   :  { %v948_v11 = vadd.f32 %v946_v56, %v938_v55 }
 0xfd2   :  { %2361 = vtanh.f32 %v948_v11 }
 0xfd3   :  { %2363 = vpow2.f32 %v1938_v13 }
 0xfdc   :  { %v2362_v12 = vpop.eup %2361 }
 0xfdd   :  { %951 = vrot.lane.b32.xlu0 %v2362_v12, %s2453_s0  ;;  %v2364_v14 = vpop.eup %2363 }
 0xfde   :  { %v932_v45 = vadd.f32 1.0, %v2364_v14 }
 0xfe0   :  { %2365 = vrcp.f32 %v932_v45 }
 0xfea   :  { %v2366_v46 = vpop.eup %2365 }
0x104f   :  { %v952_v15 = vpop.permute.xlu0 %951 }
0x1050   :  { %v2723_v49 = vmul.f32 %v2366_v46, %v952_v15 }
0x1052   :  { %1939 = vmatmul.mubr.msk.f32.vlgmr.msra.gmra.mrb[10].mxu0 %vm212_vm1, %v2723_v49 }
0x1053   :  { %1982 = vmatprep.mubr.msk.f32.mxu0 %vm2456_vm2, %v2452_v0 }
0x1125   :  { %v1024_v19 = vpop.f32.mrb[10].mxu0 }
0x1126   :  { %v1029_v20 = vadd.f32 %v1024_v19, %v208_v50  ;;  %v1026_v22 = vpop.f32.mrb[11].mxu0 }
0x1127   :  { %v1030_v23 = vadd.f32 %v1026_v22, %v210_v17 }
0x1128   :  { %v1940_v28 = vmul.f32 -1.442695, %v1029_v20 }
0x1129   :  { %2367 = vtanh.f32 %v1030_v23  ;;  %v1941_v43 = vmul.f32 -1.442695, %v1030_v23 }
0x112a   :  { %2369 = vpow2.f32 %v1940_v28 }
0x1133   :  { %v2368_v25 = vpop.eup %2367 }
0x1134   :  { %1046 = vrot.lane.b32.xlu1 %v2368_v25, %s2453_s0  ;;  %v2370_v31 = vpop.eup %2369 }
0x1135   :  { %v1037_v32 = vadd.f32 1.0, %v2370_v31 }
0x1137   :  { %2371 = vrcp.f32 %v1037_v32 }
0x1141   :  { %v2372_v33 = vpop.eup %2371 }
0x1142   :  { %v1044_v58 = vmul.f32 %v2372_v33, %v948_v11 }
0x11a6   :  { %v1047_v35 = vpop.permute.xlu1 %1046 }
0x11a7   :  { %v1049_v36 = vmul.f32 %v2372_v33, %v1047_v35 }
0x11a9   :  { %1051 = vrot.lane.b32.xlu0 %v1049_v36, %s2453_s0 }
0x121b   :  { %v1052_v60 = vpop.permute.xlu0 %1051 }
0x121c   :  { %v1054_v61 = vadd.f32 %v1052_v60, %v1044_v58 }
0x121e   :  { %2373 = vtanh.f32 %v1054_v61 }
0x121f   :  { %2375 = vpow2.f32 %v1941_v43 }
0x1228   :  { %v2374_v4 = vpop.eup %2373 }
0x1229   :  { %1057 = vrot.lane.b32.xlu1 %v2374_v4, %s2453_s0  ;;  %v2376_v16 = vpop.eup %2375  ;;  %v2187_v4 = vpack.c.bf16 %v2753_v41, %v2748_v40 }
0x122a   :  { %v1038_v44 = vadd.f32 1.0, %v2376_v16  ;;  %v2190_v16 = vpack.c.bf16 %v2786_v51, %v2781_v48 }
0x122c   :  { %2377 = vrcp.f32 %v1038_v44 }
0x122d   :  { %1399 = vrot.lane.b32.xlu1 %v1245_v38, %s2454_s16 }
0x1231   :  { %1252 = vrot.lane.b32.xlu1 %v1245_v38, %s2455_s17 }
0x1235   :  { %1070 = vrot.lane.b32.xlu1 %v2703_v2, %s2457_s18 }
0x1236   :  { %v2378_v47 = vpop.eup %2377 }
0x1239   :  { %1078 = vrot.lane.b32.xlu1 %v2663_v3, %s2457_s18 }
0x123d   :  { %1086 = vrot.lane.b32.xlu1 %v2623_v63, %s2457_s18 }
0x1241   :  { %2254 = vrot.lane.b32.xlu1 %v2759_v42, %s2457_s18 }
0x129b   :  { %v1058_v52 = vpop.permute.xlu1 %1057 }
0x129c   :  { %v2763_v53 = vmul.f32 %v2378_v47, %v1058_v52 }
0x129e   :  { %1062 = vrot.lane.b32.xlu0 %v2763_v53, %s2457_s18  ;;  %1986 = vmatpush3.msra.mxu1 %v2763_v53 }
0x129f   :  { %1988 = vmatmul.mubr.msk.f32.vlgmr.msra.gmra.mrb[16].mxu1 %vm1254_vm3, %v1245_v38  ;;  %1990 = vmatprep.subr.mxu1 %v2452_v0  ;;  %v1400_v57 = vpop.permute.xlu1 %1399 }
0x12a0   :  { %1992 = vmatprep.mubr.msk.f32.mxu1 %vm2456_vm2, %v2452_v0 }
0x12a2   :  { %1473 = vrot.lane.b32.xlu0 %v1245_v38, %s2458_s23 }
0x12a3   :  { %v1253_v59 = vpop.permute.xlu1 %1252 }
0x12a6   :  { %1066 = vrot.lane.b32.xlu0 %v2723_v49, %s2457_s18 }
0x12a7   :  { %v1071_v62 = vpop.permute.xlu1 %1070 }
0x12a8   :  { %v2808_v30 = vadd.f32 %v1071_v62, %v2643_v26 }
0x12aa   :  { %1074 = vrot.lane.b32.xlu0 %v2683_v29, %s2457_s18 }
0x12ab   :  { %v1079_v1 = vpop.permute.xlu1 %1078 }
0x12ac   :  { %v2814_v8 = vadd.f32 %v1079_v1, %v2683_v29 }
0x12ae   :  { %1082 = vrot.lane.b32.xlu0 %v2643_v26, %s2457_s18 }
0x12af   :  { %v1087_v5 = vpop.permute.xlu1 %1086 }
0x12b0   :  { %v2827_v10 = vadd.f32 %v1087_v5, %v2723_v49 }
0x12b2   :  { %1090 = vrot.lane.b32.xlu0 %v2614_v24, %s2457_s18 }
0x12b3   :  { %v2255_v21 = vpop.permute.xlu1 %2254 }
0x12b4   :  { %v2256_v27 = vunpack.i.l.bf16 %v2255_v21 }
0x12b6   :  { %2259 = vrot.lane.b32.xlu0 %v2792_v54, %s2457_s18 }
0x1310   :  { %v1063_v18 = vpop.permute.xlu0 %1062 }
0x1311   :  { %v2797_v6 = vadd.f32 %v1063_v18, %v2614_v24  ;;  %1981 = vmatpush3.msra.mxu0 %v1063_v18  ;;  %1991 = vmatpush3.msra.mxu1 %v1063_v18  ;;  %v2257_v24 = vunpack.i.h.bf16 %v2255_v21 }
0x1312   :  { %1993 = vmatmul.mubr.msk.f32.vlgmr.msra.gmra.mrb[18].mxu1 %vm1254_vm3, %v1400_v57  ;;  %1995 = vmatprep.subr.mxu1 %v2452_v0 }
0x1313   :  { %1095 = vrot.lane.b32.xlu1 %v2797_v6, %s2459_s27  ;;  %1996 = vmatpush3.msra.mxu1 %v2763_v53  ;;  %v2181_v39 = vpack.c.bf16 %v2257_v24, %v2256_v27  ;;  %v2893_v24 = vld [vmem:[%s2928_s2 + $0x28] ss:$0 sm:$0xff]  ;;  %s2462_s2 = smov [#allocation5]  }
0x1314   :  { %v1474_v7 = vpop.permute.xlu0 %1473  ;;  %1983 = vmatmul.mubr.msk.f32.vlgmr.msra.gmra.mrb[12].mxu0 %vm1254_vm3, %v1253_v59  ;;  %1997 = vmatprep.mubr.msk.f32.mxu1 %vm2456_vm2, %v2452_v0  ;;  %s1902_s4 = sshll.u32 %s2462_s2, 4  ;;  %s1903_s4 = int_to_ptr.vmem [resolvable:$true] %s1902_s4 }
0x1315   :  { %2180 = vmatprep.subr.bf16.mxu1 %v2460_v34  ;;  %s2423_s5 = scalar_lea.vmem %s1903_s4, 128  ;;  %p2428_p9 = scmp.lt.s32.totalorder %s1903_s4, %s1903_s4 }
0x1316   :  { %p2424_p8 = scmp.ne.s32.totalorder %s1903_s4, %s2423_s5  ;;  %p2429_p10 = scmp.lt.s32.totalorder %s2423_s5, %s2423_s5 }
0x1317   :  { %1119 = vrot.lane.b32.xlu1 %v2808_v30, %s2459_s27 }
0x1318   :  { %v1067_v37 = vpop.permute.xlu0 %1066  ;;  %p2430_p11 = por %p2429_p10, %p2428_p9 }
0x1319   :  { %v2817_v9 = vadd.f32 %v1067_v37, %v2623_v63 }
0x131a   :  { %1998 = vmatmul.mubr.msk.f32.vlgmr.msra.gmra.mrb[18].mxu1 %vm1254_vm3, %v1474_v7  ;;  %p2431_p12 = pnand %p2430_p11, %p2424_p8 }
0x131b   :  { %1143 = vrot.lane.b32.xlu1 %v2814_v8, %s2459_s27  ;;  %1107 = vrot.lane.b32.xlu0 %v2817_v9, %s2459_s27 }
0x131c   :  { %v1075_v26 = vpop.permute.xlu0 %1074  ;;  %2182 = vmatpush3.bf16.msra.mxu1 %v2181_v39  ;;  %2008 = vmatprep.mubr.msk.f32.mxu1 %vm2456_vm2, %v2452_v0 }
0x131d   :  { %v2830_v29 = vadd.f32 %v1075_v26, %v2663_v3  ;;  %2183 = vmatprep.subr.bf16.mxu1 %v2460_v34 }
0x131f   :  { %1167 = vrot.lane.b32.xlu1 %v2827_v10, %s2459_s27  ;;  %1131 = vrot.lane.b32.xlu0 %v2830_v29, %s2459_s27 }
0x1320   :  { %v1083_v63 = vpop.permute.xlu0 %1082 }
0x1321   :  { %v2838_v55 = vadd.f32 %v1083_v63, %v2703_v2 }
0x1323   :  { %1155 = vrot.lane.b32.xlu0 %v2838_v55, %s2459_s27 }
0x1324   :  { %v1091_v56 = vpop.permute.xlu0 %1090 }
0x1325   :  { %v2843_v11 = vadd.f32 %v1091_v56, %v2763_v53 }
0x1327   :  { %1179 = vrot.lane.b32.xlu0 %v2843_v11, %s2459_s27 }
0x1328   :  { %v2260_v3 = vpop.permute.xlu0 %2259 }
0x1329   :  { %v2262_v12 = vunpack.i.h.bf16 %v2260_v3  ;;  %v2261_v13 = vunpack.i.l.bf16 %v2260_v3 }
0x132b   :  { %v2184_v14 = vpack.c.bf16 %v2262_v12, %v2261_v13 }
0x132d   :  { %2185 = vmatpush3.bf16.msra.mxu1 %v2184_v14 }
0x132e   :  { %2186 = vmatprep.subr.bf16.mxu1 %v2460_v34 }
0x1372   :  { %v1395_v45 = vpop.f32.mrb[16].mxu1 }
0x1373   :  { %v1989_v2 = vpop.f32.mrb[17].mxu1 }
0x1385   :  { %v1096_v46 = vpop.permute.xlu1 %1095 }
0x1386   :  { %v1098_v15 = vmul.f32 %v1096_v46, %v2763_v53 }
0x1388   :  { %1100 = vrot.lane.b32.xlu1 %v1098_v15, %s2457_s18 }
0x1389   :  { %v1120_v49 = vpop.permute.xlu1 %1119 }
0x138a   :  { %v1122_v50 = vmul.f32 %v1120_v49, %v2763_v53 }
0x138c   :  { %1124 = vrot.lane.b32.xlu1 %v1122_v50, %s2457_s18 }
0x138d   :  { %v1144_v17 = vpop.permute.xlu1 %1143  ;;  %v1108_v19 = vpop.permute.xlu0 %1107 }
0x138e   :  { %v1146_v20 = vmul.f32 %v1144_v17, %v2763_v53  ;;  %v1110_v22 = vmul.f32 %v1108_v19, %v2763_v53 }
0x1390   :  { %1148 = vrot.lane.b32.xlu1 %v1146_v20, %s2457_s18  ;;  %1112 = vrot.lane.b32.xlu0 %v1110_v22, %s2457_s18 }
0x1391   :  { %v1168_v23 = vpop.permute.xlu1 %1167  ;;  %v1132_v25 = vpop.permute.xlu0 %1131 }
0x1392   :  { %v1170_v28 = vmul.f32 %v1168_v23, %v2763_v53  ;;  %v1134_v31 = vmul.f32 %v1132_v25, %v2763_v53 }
0x1394   :  { %1172 = vrot.lane.b32.xlu1 %v1170_v28, %s2457_s18  ;;  %1136 = vrot.lane.b32.xlu0 %v1134_v31, %s2457_s18 }
0x1395   :  { %v1156_v32 = vpop.permute.xlu0 %1155 }
0x1396   :  { %v1158_v33 = vmul.f32 %v1156_v32, %v2763_v53 }
0x1398   :  { %1160 = vrot.lane.b32.xlu0 %v1158_v33, %s2457_s18 }
0x1399   :  { %v1180_v35 = vpop.permute.xlu0 %1179 }
0x139a   :  { %v1182_v36 = vmul.f32 %v1180_v35, %v2763_v53 }
0x139c   :  { %1184 = vrot.lane.b32.xlu0 %v1182_v36, %s2457_s18 }
0x13e7   :  { %v1323_v58 = vpop.f32.mrb[12].mxu0 }
0x13e8   :  { %v1396_v60 = vadd.f32 %v1395_v45, %v1323_v58  ;;  %v1984_v61 = vpop.f32.mrb[13].mxu0 }
0x13ed   :  { %v1543_v38 = vpop.f32.mrb[18].mxu1 }
0x13ee   :  { %v1999_v43 = vpop.f32.mrb[19].mxu1  ;;  %2009 = vmatmul.mubr.msk.f32.vlgmr.msra.gmra.mrb[20].mxu1 %vm74_vm0, %v1543_v38 }
0x13ef   :  { %2188 = vmatpush3.bf16.msra.mxu1 %v2187_v4  ;;  %2019 = vmatprep.mubr.msk.f32.mxu1 %vm2456_vm2, %v2452_v0 }
0x13f0   :  { %2189 = vmatprep.subr.bf16.mxu1 %v2460_v34 }
0x13f3   :  { %2191 = vmatpush3.bf16.msra.mxu1 %v2190_v16 }
0x13f4   :  { %2192 = vmatprep.subr.bf16.mxu1 %v2460_v34 }
0x13f6   :  { %2020 = vmatmul.mubr.msk.f32.vlgmr.msra.gmra.mrb[22].mxu1 %vm74_vm0, %v1396_v60 }
0x13f7   :  { %2030 = vmatprep.mubr.msk.f32.mxu1 %vm2456_vm2, %v2452_v0 }
0x13fa   :  { %v1101_v40 = vpop.permute.xlu1 %1100 }
0x13fb   :  { %v1103_v41 = vsel %vm74_vm0, %v1101_v40, 0.0 }
0x13fc   :  { %1104 = vadd.xlane.f32.xlu1 %v1103_v41 }
0x13fe   :  { %v1125_v44 = vpop.permute.xlu1 %1124 }
0x13ff   :  { %v1127_v51 = vsel %vm74_vm0, %v1125_v44, 0.0 }
0x1402   :  { %v1113_v47 = vpop.permute.xlu0 %1112  ;;  %v1149_v53 = vpop.permute.xlu1 %1148 }
0x1403   :  { %v1115_v52 = vsel %vm74_vm0, %v1113_v47, 0.0  ;;  %v1151_v62 = vsel %vm74_vm0, %v1149_v53, 0.0 }
0x1404   :  { %1116 = vadd.xlane.f32.xlu0 %v1115_v52 }
0x1406   :  { %v1137_v48 = vpop.permute.xlu0 %1136  ;;  %v1173_v5 = vpop.permute.xlu1 %1172 }
0x1407   :  { %v1139_v57 = vsel %vm74_vm0, %v1137_v48, 0.0  ;;  %v1175_v21 = vsel %vm74_vm0, %v1173_v5, 0.0 }
0x1408   :  { %1128 = vadd.xlane.f32.xlu0 %v1127_v51  ;;  %1140 = vadd.xlane.f32.xlu1 %v1139_v57 }
0x140a   :  { %v1161_v59 = vpop.permute.xlu0 %1160 }
0x140b   :  { %v1163_v1 = vsel %vm74_vm0, %v1161_v59, 0.0 }
0x140c   :  { %1152 = vadd.xlane.f32.xlu0 %v1151_v62  ;;  %1164 = vadd.xlane.f32.xlu1 %v1163_v1 }
0x140e   :  { %v1185_v18 = vpop.permute.xlu0 %1184 }
0x140f   :  { %v1187_v7 = vsel %vm74_vm0, %v1185_v18, 0.0 }
0x1410   :  { %1176 = vadd.xlane.f32.xlu0 %v1175_v21  ;;  %1188 = vadd.xlane.f32.xlu1 %v1187_v7 }
0x1421   :  { %2269 = vrot.lane.b32.xlu1 %v2792_v54, %s2461_s28 }
0x1425   :  { %2274 = vrot.lane.b32.xlu1 %v2759_v42, %s2453_s0 }
0x1426   :  { %2264 = vrot.lane.b32.xlu0 %v2759_v42, %s2461_s28 }
0x1429   :  { %1885 = vrot.lane.b32.xlu1 %v2893_v24, %s2453_s0 }
0x142a   :  { %2279 = vrot.lane.b32.xlu0 %v2792_v54, %s2453_s0 }
0x1489   :  { %v1105_v27 = vpop.xlane.xlu1 %1104 }
0x1491   :  { %v1117_v37 = vpop.xlane.xlu0 %1116 }
0x1492   :  { %v1190_v39 = vmax.f32 %v1105_v27, %v1117_v37 }
0x1495   :  { %v1141_v26 = vpop.xlane.xlu1 %1140  ;;  %v1129_v63 = vpop.xlane.xlu0 %1128 }
0x1496   :  { %v1191_v56 = vmax.f32 %v1190_v39, %v1129_v63 }
0x1498   :  { %v1192_v3 = vmax.f32 %v1191_v56, %v1141_v26 }
0x1499   :  { %v1165_v12 = vpop.xlane.xlu1 %1164  ;;  %v1153_v42 = vpop.xlane.xlu0 %1152 }
0x149a   :  { %v1193_v13 = vmax.f32 %v1192_v3, %v1153_v42 }
0x149c   :  { %v1194_v14 = vmax.f32 %v1193_v13, %v1165_v12 }
0x149d   :  { %v1177_v54 = vpop.xlane.xlu0 %1176  ;;  %v1189_v2 = vpop.xlane.xlu1 %1188 }
0x149e   :  { %v1195_v45 = vmax.f32 %v1194_v14, %v1177_v54 }
0x14a0   :  { %v1196_v46 = vmax.f32 %v1195_v45, %v1189_v2 }
0x14a1   :  { %v2265_v15 = vpop.permute.xlu0 %2264  ;;  %v2270_v20 = vpop.permute.xlu1 %2269 }
0x14a2   :  { %v1197_v49 = vsub.f32 %v1105_v27, %v1196_v46  ;;  %v1200_v50 = vsub.f32 %v1117_v37, %v1196_v46  ;;  %v1203_v17 = vsub.f32 %v1129_v63, %v1196_v46  ;;  %v1206_v19 = vsub.f32 %v1141_v26, %v1196_v46 }
0x14a3   :  { %v2267_v28 = vunpack.i.h.bf16 %v2265_v15  ;;  %v1209_v31 = vsub.f32 %v1153_v42, %v1196_v46  ;;  %v2266_v32 = vunpack.i.l.bf16 %v2265_v15  ;;  %v2272_v35 = vunpack.i.h.bf16 %v2270_v20 }
0x14a4   :  { %v1198_v22 = vmul.f32 1.442695, %v1197_v49  ;;  %v1201_v23 = vmul.f32 1.442695, %v1200_v50  ;;  %v1204_v25 = vmul.f32 1.442695, %v1203_v17  ;;  %v1212_v36 = vsub.f32 %v1165_v12, %v1196_v46 }
0x14a5   :  { %v1207_v33 = vmul.f32 1.442695, %v1206_v19  ;;  %v2193_v58 = vpack.c.bf16 %v2267_v28, %v2266_v32  ;;  %v2271_v60 = vunpack.i.l.bf16 %v2270_v20  ;;  %v1210_v61 = vmul.f32 1.442695, %v1209_v31  ;;  %v2280_v15 = vpop.permute.xlu0 %2279 }
0x14a6   :  { %2379 = vpow2.f32 %v1198_v22  ;;  %v1215_v4 = vsub.f32 %v1177_v54, %v1196_v46  ;;  %v1213_v43 = vmul.f32 1.442695, %v1212_v36  ;;  %v1218_v16 = vsub.f32 %v1189_v2, %v1196_v46 }
0x14a7   :  { %2381 = vpow2.f32 %v1201_v23  ;;  %v2196_v38 = vpack.c.bf16 %v2272_v35, %v2271_v60  ;;  %2194 = vmatpush3.bf16.msra.mxu1 %v2193_v58  ;;  %v2281_v23 = vunpack.i.l.bf16 %v2280_v15 }
0x14a8   :  { %2383 = vpow2.f32 %v1204_v25  ;;  %2195 = vmatprep.subr.bf16.mxu1 %v2460_v34  ;;  %v1216_v40 = vmul.f32 1.442695, %v1215_v4  ;;  %v1219_v41 = vmul.f32 1.442695, %v1218_v16 }
0x14a9   :  { %2385 = vpow2.f32 %v1207_v33 }
0x14aa   :  { %2387 = vpow2.f32 %v1210_v61 }
0x14ab   :  { %2197 = vmatpush3.bf16.msra.mxu1 %v2196_v38  ;;  %2389 = vpow2.f32 %v1213_v43 }
0x14ac   :  { %2198 = vmatprep.subr.bf16.mxu1 %v2460_v34  ;;  %2391 = vpow2.f32 %v1216_v40 }
0x14ad   :  { %2393 = vpow2.f32 %v1219_v41 }
0x14b0   :  { %v2380_v44 = vpop.eup %2379 }
0x14b1   :  { %v2382_v47 = vpop.eup %2381  ;;  %v1229_v52 = vmul.f32 %v2380_v44, %v2797_v6 }
0x14b2   :  { %v2384_v53 = vpop.eup %2383  ;;  %v1221_v48 = vadd.f32 %v2382_v47, %v2380_v44  ;;  %v1230_v51 = vmul.f32 %v2382_v47, %v2817_v9 }
0x14b3   :  { %v2386_v57 = vpop.eup %2385  ;;  %v1232_v1 = vmul.f32 %v2384_v53, %v2808_v30 }
0x14b4   :  { %v1222_v59 = vadd.f32 %v2384_v53, %v1221_v48  ;;  %v1231_v62 = vadd.f32 %v1230_v51, %v1229_v52  ;;  %v2388_v21 = vpop.eup %2387  ;;  %v1234_v7 = vmul.f32 %v2386_v57, %v2830_v29  ;;  %v2275_v29 = vpop.permute.xlu1 %2274 }
0x14b5   :  { %v2390_v37 = vpop.eup %2389  ;;  %v1236_v63 = vmul.f32 %v2388_v21, %v2814_v8  ;;  %v2277_v2 = vunpack.i.h.bf16 %v2275_v29  ;;  %v2276_v46 = vunpack.i.l.bf16 %v2275_v29 }
0x14b6   :  { %v1223_v5 = vadd.f32 %v2386_v57, %v1222_v59  ;;  %v1233_v18 = vadd.f32 %v1232_v1, %v1231_v62  ;;  %v2392_v6 = vpop.eup %2391  ;;  %v1238_v42 = vmul.f32 %v2390_v37, %v2838_v55  ;;  %v2282_v55 = vunpack.i.h.bf16 %v2280_v15 }
0x14b7   :  { %v2394_v9 = vpop.eup %2393  ;;  %v1240_v54 = vmul.f32 %v2392_v6, %v2827_v10  ;;  %v2199_v19 = vpack.c.bf16 %v2277_v2, %v2276_v46 }
0x14b8   :  { %v1224_v27 = vadd.f32 %v2388_v21, %v1223_v5  ;;  %v1235_v39 = vadd.f32 %v1234_v7, %v1233_v18  ;;  %v1242_v49 = vmul.f32 %v2394_v9, %v2843_v11  ;;  %v2202_v28 = vpack.c.bf16 %v2282_v55, %v2281_v23  ;;  %v1886_v33 = vpop.permute.xlu1 %1885 }
0x14ba   :  { %v1225_v26 = vadd.f32 %v2390_v37, %v1224_v27  ;;  %v1237_v3 = vadd.f32 %v1236_v63, %v1235_v39 }
0x14bc   :  { %v1226_v56 = vadd.f32 %v2392_v6, %v1225_v26  ;;  %v1239_v30 = vadd.f32 %v1238_v42, %v1237_v3 }
0x14be   :  { %v1227_v12 = vadd.f32 %v2394_v9, %v1226_v56  ;;  %v1241_v45 = vadd.f32 %v1240_v54, %v1239_v30 }
0x14c0   :  { %2395 = vrcp.f32 %v1227_v12  ;;  %v1243_v50 = vadd.f32 %v1242_v49, %v1241_v45 }
0x14c1   :  { %v1632_v13 = vpop.f32.mrb[20].mxu1 }
0x14c2   :  { %v2010_v14 = vpop.f32.mrb[21].mxu1 }
0x14c9   :  { %v1705_v8 = vpop.f32.mrb[22].mxu1 }
0x14ca   :  { %v2396_v17 = vpop.eup %2395  ;;  %v1706_v20 = vadd.f32 %v1705_v8, %v1632_v13  ;;  %v2021_v22 = vpop.f32.mrb[23].mxu1 }
0x14cb   :  { %v1244_v25 = vmul.f32 %v2396_v17, %v1243_v50 }
0x14cc   :  { %v1713_v10 = vadd.f32 %v2893_v24, %v1706_v20 }
0x14cd   :  { %2031 = vmatmul.mubr.msk.f32.vlgmr.msra.gmra.mrb[24].mxu1 %vm74_vm0, %v1244_v25 }
0x14ce   :  { %2200 = vmatpush3.bf16.msra.mxu1 %v2199_v19  ;;  %2041 = vmatprep.mubr.msk.f32.mxu1 %vm2456_vm2, %v2452_v0 }
0x14cf   :  { %2201 = vmatprep.subr.bf16.mxu1 %v2460_v34 }
0x14d2   :  { %2203 = vmatpush3.bf16.msra.mxu1 %v2202_v28 }
0x14d5   :  { %2042 = vmatmul.mubr.msk.f32.vlgmr.msra.gmra.mrb[26].mxu1 %vm74_vm0, %v1713_v10 }
0x15a0   :  { %v1795_v11 = vpop.f32.mrb[24].mxu1 }
0x15a1   :  { %v2032_v31 = vpop.f32.mrb[25].mxu1 }
0x15a8   :  { %v1880_v32 = vpop.f32.mrb[26].mxu1 }
0x15a9   :  { %v1881_v35 = vadd.f32 %v1880_v32, %v1795_v11  ;;  %v2043_v36 = vpop.f32.mrb[27].mxu1 }
0x15ab   :  { %v1888_v58 = vadd.f32 %v1886_v33, %v1881_v35 }
0x15ad   :  { %v1951_v60 = vmul.f32 -1.442695, %v1888_v58 }
0x15af   :  { %2397 = vpow2.f32 %v1951_v60 }
0x15b9   :  { %v2398_v61 = vpop.eup %2397 }
0x15ba   :  { %v1892_v4 = vadd.f32 1.0, %v2398_v61 }
0x15bc   :  { %2399 = vrcp.f32 %v1892_v4 }
0x15c6   :  { %v2400_v0 = vpop.eup %2399 }
0x15c7   :  { %1895 = vst.msk [vmem:[#allocation5] sm:$0xff] %vm1254_vm3, %v2400_v0 }
0x15c8   :  { %2434 = shalt.err (!%p2431_p12)
}
0x15c9   :  { %s2435_s8 = scalar_lea.hbm %s2929_s3, 128 }
0x15ca   :  { %p2436_p13 = scmp.ne.s32.totalorder %s2929_s3, %s2435_s8  ;;  %p2439_p0 = scmp.lt.u32.totalorder %s2435_s8, %s2929_s3 }
0x15cc   :  { %p2441_p1 = pnand %p2439_p0, %p2436_p13 }
0x15ce   :  { %2444 = shalt.err (!%p2441_p1)
}
0x15cf   :  { %1905 = dma.vmem_to_hbm [thread:$0]  %s1903_s4, 128, %s2929_s3, [#allocation4]  }
0x15d0   :  { %2447 = dma.done.wait [#allocation4], 128  }
0x15d1   :  { %2448 = vsyncadd [#allocation4], 4294967168 }
0x15d2   :  { %1909 = vsyncpa [#allocation3], 1 }
0x15d3   :  { %1910 = vsyncpa [#allocation4], 1 }

</bundles_post_ra>
